<compile_context>
chip_gen: v6e
topology: v6e:2x2x1
jax: 0.10.0
libtpu: 0.0.40
codegen_flags: <defaults>
</compile_context>

<pallas_src>
import functools

import jax
import jax.numpy as jnp
from jax.experimental import pallas as pl
from jax.experimental.pallas import tpu as pltpu


# -----------------------------------------------------------------------------
# Kernel: TT timesteps of the LSTM recurrence for one direction.
# grid = (num_directions ["parallel"], num_time_chunks ["arbitrary"]).
# -----------------------------------------------------------------------------
def _lstm_chunk_kernel(
    pg_ref,    # (1, TT, B, 4H) pre-gates: (x*in_drop) @ W_ih^T + b (time chunk)
    m_ref,     # (1, TT, B, 1)  padding mask (time chunk)
    whh_ref,   # (1, H, 4H)     W_hh^T for this direction (resident)
    h0_ref,    # (B, H)         initial hidden (resident)
    c0_ref,    # (B, H)         initial cell   (resident)
    hd_ref,    # (B, H)         hidden dropout mask (ones in eval, resident)
    out_ref,   # (1, TT, B, H)  per-step hidden output
    hn_ref,    # (1, B, H)      final hidden (post-dropout, matches PyTorch)
    cn_ref,    # (1, B, H)      final cell
    h_sc,      # VMEM (B, H)    recurrent h carry across chunks
    c_sc,      # VMEM (B, H)    recurrent c carry across chunks
    *,
    seq_len,   # real T (before time padding)
    chunk,     # TT (static)
):
    c_idx = pl.program_id(1)
    n_chunks = pl.num_programs(1)
    H = h_sc.shape[-1]

    @pl.when(c_idx == 0)
    def _():
        h_sc[...] = h0_ref[...].astype(jnp.float32)
        c_sc[...] = c0_ref[...].astype(jnp.float32)

    h0 = h0_ref[...].astype(jnp.float32)
    c0 = c0_ref[...].astype(jnp.float32)
    hd = hd_ref[...].astype(jnp.float32)
    whh = whh_ref[0]                                     # (H, 4H)

    h = h_sc[...]
    c = c_sc[...]
    if seq_len % chunk != 0:
        base_t = c_idx * chunk

    # Static full unroll over the time chunk (TT is small and fixed).
    for s in range(chunk):
        # Only the recurrent matmul is on the serial critical path.
        gates = pg_ref[0, s].astype(jnp.float32) + jnp.dot(
            h, whh, preferred_element_type=jnp.float32)            # (B, 4H)

        sig = jax.nn.sigmoid(gates)          # single full-lane pass for i, f, o
        i_g = sig[:, 0 * H:1 * H]
        f_g = sig[:, 1 * H:2 * H]
        o_g = sig[:, 3 * H:4 * H]
        g_g = jnp.tanh(gates[:, 2 * H:3 * H])

        c_new = f_g * c + i_g * g_g
        h_new = o_g * jnp.tanh(c_new)

        # Padding-mask blend against the INITIAL state (matches _forward_rnn).
        m = m_ref[0, s].astype(jnp.float32)                         # (B, 1)
        h_new = h_new * m + h0 * (1.0 - m)
        c_new = c_new * m + c0 * (1.0 - m)

        out_ref[0, s] = h_new.astype(out_ref.dtype)

        # Hidden dropout only affects the recurrent carry (and the final h_n),
        # not the recorded per-step output.
        if seq_len % chunk == 0:
            h = h_new * hd
            c = c_new
        else:
            valid = (base_t + s) < seq_len   # skip padded timesteps
            h = jnp.where(valid, h_new * hd, h)
            c = jnp.where(valid, c_new, c)

    h_sc[...] = h
    c_sc[...] = c

    @pl.when(c_idx == n_chunks - 1)          # final-state store: once per dir
    def _():
        hn_ref[0] = h_sc[...].astype(hn_ref.dtype)
        cn_ref[0] = c_sc[...].astype(cn_ref.dtype)


# -----------------------------------------------------------------------------
# One layer (all directions fused into one pallas_call).
# -----------------------------------------------------------------------------
def _run_lstm_layer(pre_gates, masks, whh_t, h0, c0, hid_drop, *, seq_len, chunk):
    """pre_gates: (ND, T_pad, B, 4H); masks: (ND, T_pad, B, 1); whh_t: (ND, H, 4H)."""
    ND, T_pad, B, G = pre_gates.shape
    H = G // 4
    n_chunks = T_pad // chunk

    kernel = functools.partial(_lstm_chunk_kernel, seq_len=seq_len, chunk=chunk)

    out, h_n, c_n = pl.pallas_call(
        kernel,
        out_shape=(
            jax.ShapeDtypeStruct((ND, T_pad, B, H), pre_gates.dtype),
            jax.ShapeDtypeStruct((ND, B, H), pre_gates.dtype),
            jax.ShapeDtypeStruct((ND, B, H), pre_gates.dtype),
        ),
        grid_spec=pltpu.PrefetchScalarGridSpec(
            num_scalar_prefetch=0,
            grid=(ND, n_chunks),
            in_specs=[
                pl.BlockSpec((1, chunk, B, G), lambda d, t: (d, t, 0, 0)),  # pre-gates
                pl.BlockSpec((1, chunk, B, 1), lambda d, t: (d, t, 0, 0)),  # mask
                pl.BlockSpec((1, H, G), lambda d, t: (d, 0, 0)),            # W_hh^T
                pl.BlockSpec((B, H), lambda d, t: (0, 0)),                  # h0
                pl.BlockSpec((B, H), lambda d, t: (0, 0)),                  # c0
                pl.BlockSpec((B, H), lambda d, t: (0, 0)),                  # hid drop
            ],
            out_specs=[
                pl.BlockSpec((1, chunk, B, H), lambda d, t: (d, t, 0, 0)),  # h_t
                pl.BlockSpec((1, B, H), lambda d, t: (d, 0, 0)),            # final h
                pl.BlockSpec((1, B, H), lambda d, t: (d, 0, 0)),            # final c
            ],
            scratch_shapes=[
                pltpu.VMEM((B, H), jnp.float32),   # h carry
                pltpu.VMEM((B, H), jnp.float32),   # c carry
            ],
        ),
        compiler_params=pltpu.CompilerParams(
            # Direction axis can shard across TensorCores (v7x); the time-chunk
            # axis is a true recurrence -> "arbitrary".
            dimension_semantics=("parallel", "arbitrary"),
        ),
    )(pre_gates, masks, whh_t, h0, c0, hid_drop)
    return out, h_n, c_n


# -----------------------------------------------------------------------------
# Full MyLSTM forward (multi-layer, optional bidirectional).
# -----------------------------------------------------------------------------
def my_lstm_forward(x, masks, params, *, hidden_size, num_layers=1,
                    bidirectional=False, batch_first=False, initial=None,
                    input_drop_masks=None, hidden_drop_masks=None,
                    time_chunk=32):
    """x: [T,B,D] (or [B,T,D] if batch_first), masks: [T,B] (or [B,T]) floats."""
    if batch_first:
        x = jnp.transpose(x, (1, 0, 2))
        masks = jnp.transpose(masks, (1, 0))
    T, B, _ = x.shape
    H = hidden_size
    ND = 2 if bidirectional else 1
    dirs = ["forward", "backward"][:ND]
    masks3 = masks.reshape(T, B, 1).astype(x.dtype)

    TT = max(1, min(time_chunk, T))
    n_chunks = -(-T // TT)
    T_pad = n_chunks * TT
    pad_t = T_pad - T

    def pad_time(a):
        if pad_t == 0:
            return a
        return jnp.pad(a, ((0, pad_t),) + ((0, 0),) * (a.ndim - 1))

    if initial is None:
        z = jnp.zeros((B, H), dtype=x.dtype)
        initial = (z, z)
    h0, c0 = initial

    h_n, c_n = [], []
    layer_input = x
    for layer in range(num_layers):
        d_in = layer_input.shape[-1]
        in_drop = (None if input_drop_masks is None
                   else input_drop_masks[layer].astype(x.dtype))
        hid_drop = (jnp.ones((B, H), x.dtype) if hidden_drop_masks is None
                    else hidden_drop_masks[layer].astype(x.dtype))

        xd = layer_input if in_drop is None else layer_input * in_drop[None, :, :]
        xd2 = xd.reshape(T * B, d_in)

        pg_dirs, mask_dirs, whh_dirs = [], [], []
        for d in dirs:
            p = params[layer][d]
            wih_t = p["weight_ih"].T.astype(x.dtype)                 # (d_in, 4H)
            bias = (p["bias_ih"] + p["bias_hh"]).astype(x.dtype)     # (4H,)
            # Input projection hoisted out of the recurrence: one big matmul
            # over all T*B rows (MXU-friendly; could also be a tiled Pallas matmul).
            pg = (jnp.dot(xd2, wih_t, preferred_element_type=jnp.float32)
                  .astype(x.dtype).reshape(T, B, 4 * H) + bias)
            msk = masks3
            if d == "backward":
                # Time-reverse in the wrapper so the kernel is direction-agnostic.
                pg = jnp.flip(pg, axis=0)
                msk = jnp.flip(msk, axis=0)
            pg_dirs.append(pad_time(pg))
            mask_dirs.append(pad_time(msk))
            whh_dirs.append(p["weight_hh"].T.astype(x.dtype))        # (H, 4H)

        pre_gates = jnp.stack(pg_dirs, axis=0)      # (ND, T_pad, B, 4H)
        masks_nd = jnp.stack(mask_dirs, axis=0)     # (ND, T_pad, B, 1)
        whh_t = jnp.stack(whh_dirs, axis=0)         # (ND, H, 4H)

        out_nd, hn_nd, cn_nd = _run_lstm_layer(
            pre_gates, masks_nd, whh_t, h0, c0, hid_drop,
            seq_len=T, chunk=TT)

        f_out = out_nd[0, :T]
        if bidirectional:
            b_out = jnp.flip(out_nd[1, :T], axis=0)
            layer_input = jnp.concatenate([f_out, b_out], axis=2)
            h_n.append(jnp.concatenate([hn_nd[0], hn_nd[1]], axis=1))
            c_n.append(jnp.concatenate([cn_nd[0], cn_nd[1]], axis=1))
        else:
            layer_input = f_out
            h_n.append(hn_nd[0])
            c_n.append(cn_nd[0])

    h_n = jnp.stack(h_n, 0)
    c_n = jnp.stack(c_n, 0)
    out = layer_input
    if batch_first:
        out = jnp.transpose(out, (1, 0, 2))
    return out, (h_n, c_n)


# -----------------------------------------------------------------------------
# Pure-JAX reference (mirrors the PyTorch module exactly).
# -----------------------------------------------------------------------------
def _lstm_cell_ref(x, h, c, wih, whh, bih, bhh):
    gates = x @ wih.T + bih + h @ whh.T + bhh
    i, f, g, o = jnp.split(gates, 4, axis=-1)
    i, f, o = jax.nn.sigmoid(i), jax.nn.sigmoid(f), jax.nn.sigmoid(o)
    g = jnp.tanh(g)
    c_next = f * c + i * g
    h_next = o * jnp.tanh(c_next)
    return h_next, c_next


def _forward_rnn_ref(x, masks3, initial, wih, whh, bih, bhh, hid_drop, reverse):
    T = x.shape[0]
    h0, c0 = initial
    h, c = h0, c0
    outs = [None] * T
    times = range(T - 1, -1, -1) if reverse else range(T)
    for t in times:
        h_next, c_next = _lstm_cell_ref(x[t], h, c, wih, whh, bih, bhh)
        m = masks3[t]
        h_next = h_next * m + h0 * (1.0 - m)
        c_next = c_next * m + c0 * (1.0 - m)
        outs[t] = h_next
        if hid_drop is not None:
            h_next = h_next * hid_drop
        h, c = h_next, c_next
    return jnp.stack(outs, 0), (h, c)


def my_lstm_ref(x, masks, params, *, hidden_size, num_layers, bidirectional,
                input_drop_masks=None, hidden_drop_masks=None):
    T, B, _ = x.shape
    H = hidden_size
    masks3 = masks.reshape(T, B, 1).astype(x.dtype)
    z = jnp.zeros((B, H), x.dtype)
    initial = (z, z)
    h_n, c_n = [], []
    layer_input = x
    for layer in range(num_layers):
        in_drop = None if input_drop_masks is None else input_drop_masks[layer]
        hid_drop = None if hidden_drop_masks is None else hidden_drop_masks[layer]
        if in_drop is not None:
            layer_input = layer_input * in_drop[None, :, :]
        pf = params[layer]["forward"]
        fo, (fh, fc) = _forward_rnn_ref(layer_input, masks3, initial,
                                        pf["weight_ih"], pf["weight_hh"],
                                        pf["bias_ih"], pf["bias_hh"],
                                        hid_drop, reverse=False)
        if bidirectional:
            pb = params[layer]["backward"]
            bo, (bh, bc) = _forward_rnn_ref(layer_input, masks3, initial,
                                            pb["weight_ih"], pb["weight_hh"],
                                            pb["bias_ih"], pb["bias_hh"],
                                            hid_drop, reverse=True)
            h_n.append(jnp.concatenate([fh, bh], 1))
            c_n.append(jnp.concatenate([fc, bc], 1))
            layer_input = jnp.concatenate([fo, bo], 2)
        else:
            h_n.append(fh)
            c_n.append(fc)
            layer_input = fo
    return layer_input, (jnp.stack(h_n, 0), jnp.stack(c_n, 0))


# -----------------------------------------------------------------------------
# Parameter init (deterministic; orthogonal init not reproduced — init only).
# -----------------------------------------------------------------------------
def init_params(key, input_size, hidden_size, num_layers, bidirectional):
    directions = ["forward", "backward"] if bidirectional else ["forward"]
    num_dir = len(directions)
    params = []
    for layer in range(num_layers):
        d_in = input_size if layer == 0 else hidden_size * num_dir
        layer_params = {}
        for d in directions:
            key, k1, k2, k3, k4 = jax.random.split(key, 5)
            layer_params[d] = {
                "weight_ih": 0.1 * jax.random.normal(
                    k1, (4 * hidden_size, d_in), jnp.float32),
                "weight_hh": 0.1 * jax.random.normal(
                    k2, (4 * hidden_size, hidden_size), jnp.float32),
                "bias_ih": 0.01 * jax.random.normal(
                    k3, (4 * hidden_size,), jnp.float32),
                "bias_hh": 0.01 * jax.random.normal(
                    k4, (4 * hidden_size,), jnp.float32),
            }
        params.append(layer_params)
    return params


# -----------------------------------------------------------------------------
# Demo / self-test
# -----------------------------------------------------------------------------
if __name__ == "__main__":
    T, B, D, H = 8, 2, 32, 32
    num_layers = 2
    bidirectional = True
    dropout_in, dropout_out = 0.25, 0.25

    key = jax.random.PRNGKey(0)
    key, kx, kp = jax.random.split(key, 3)
    x = jax.random.normal(kx, (T, B, D), dtype=jnp.float32)

    # Padding masks: sequence lengths (8, 5) -> masks[t, b] = 1.0 if t < len[b].
    lens = jnp.array([T, 5])
    masks = (jnp.arange(T)[:, None] < lens[None, :]).astype(jnp.float32)  # (T, B)

    params = init_params(kp, D, H, num_layers, bidirectional)

    tol = dict(atol=5e-3, rtol=5e-3)

    # -------- eval mode (no dropout) --------
    out, (h_n, c_n) = my_lstm_forward(
        x, masks, params, hidden_size=H, num_layers=num_layers,
        bidirectional=bidirectional)
    out = jax.block_until_ready(out)
    ref_out, (ref_h, ref_c) = my_lstm_ref(
        x, masks, params, hidden_size=H, num_layers=num_layers,
        bidirectional=bidirectional)
    assert out.shape == (T, B, 2 * H)
    assert h_n.shape == (num_layers, B, 2 * H)
    assert jnp.allclose(out, ref_out, **tol)
    assert jnp.allclose(h_n, ref_h, **tol)
    assert jnp.allclose(c_n, ref_c, **tol)

    # -------- training mode: deterministic pre-sampled inverted-dropout masks --------
    num_dir = 2 if bidirectional else 1
    in_drops, hid_drops = [], []
    for layer in range(num_layers):
        d_in = D if layer == 0 else H * num_dir
        key, k1, k2 = jax.random.split(key, 3)
        im = jax.random.bernoulli(k1, 1.0 - dropout_in, (B, d_in)).astype(
            jnp.float32) / (1.0 - dropout_in)
        hm = jax.random.bernoulli(k2, 1.0 - dropout_out, (B, H)).astype(
            jnp.float32) / (1.0 - dropout_out)
        in_drops.append(im)
        hid_drops.append(hm)

    out_t, (h_t, c_t) = my_lstm_forward(
        x, masks, params, hidden_size=H, num_layers=num_layers,
        bidirectional=bidirectional,
        input_drop_masks=in_drops, hidden_drop_masks=hid_drops)
    out_t = jax.block_until_ready(out_t)
    ref_out_t, (ref_h_t, ref_c_t) = my_lstm_ref(
        x, masks, params, hidden_size=H, num_layers=num_layers,
        bidirectional=bidirectional,
        input_drop_masks=in_drops, hidden_drop_masks=hid_drops)
    assert jnp.allclose(out_t, ref_out_t, **tol)
    assert jnp.allclose(h_t, ref_h_t, **tol)
    assert jnp.allclose(c_t, ref_c_t, **tol)

    print("KERNEL_OK")
</pallas_src>

<mosaic_0001>
module attributes {stable_mosaic.version = 11 : i64} {
  func.func @_lstm_chunk_kernel(%arg0: i32, %arg1: i32, %arg2: memref<1x8x2x128xf32, #tpu.memory_space<vmem>>, %arg3: memref<1x8x2x1xf32, #tpu.memory_space<vmem>>, %arg4: memref<1x32x128xf32, #tpu.memory_space<vmem>>, %arg5: memref<2x32xf32, #tpu.memory_space<vmem>>, %arg6: memref<2x32xf32, #tpu.memory_space<vmem>>, %arg7: memref<2x32xf32, #tpu.memory_space<vmem>>, %arg8: memref<1x8x2x32xf32, #tpu.memory_space<vmem>>, %arg9: memref<1x2x32xf32, #tpu.memory_space<vmem>>, %arg10: memref<1x2x32xf32, #tpu.memory_space<vmem>>, %arg11: memref<2x32xf32, #tpu.memory_space<vmem>>, %arg12: memref<2x32xf32, #tpu.memory_space<vmem>>) attributes {dimension_semantics = [#tpu.dimension_semantics<parallel>, #tpu.dimension_semantics<arbitrary>], iteration_bounds = array<i64: 2, 1>, scalar_prefetch = 0 : i64, scratch_operands = 2 : i64, tpu.core_type = #tpu.core_type<tc>, window_params = [{transform_indices = @transform_0, window_bounds = array<i64: 1, 8, 2, 128>}, {transform_indices = @transform_1, window_bounds = array<i64: 1, 8, 2, 1>}, {transform_indices = @transform_2, window_bounds = array<i64: 1, 32, 128>}, {pipeline_mode = #tpu.pipeline_mode<synchronous>, transform_indices = @transform_3, window_bounds = array<i64: 2, 32>}, {pipeline_mode = #tpu.pipeline_mode<synchronous>, transform_indices = @transform_4, window_bounds = array<i64: 2, 32>}, {pipeline_mode = #tpu.pipeline_mode<synchronous>, transform_indices = @transform_5, window_bounds = array<i64: 2, 32>}, {transform_indices = @transform_6, window_bounds = array<i64: 1, 8, 2, 32>}, {transform_indices = @transform_7, window_bounds = array<i64: 1, 2, 32>}, {transform_indices = @transform_8, window_bounds = array<i64: 1, 2, 32>}]} {
    %c0_i32 = arith.constant 0 : i32
    %0 = arith.cmpi eq, %arg1, %c0_i32 : i32
    %1 = arith.extui %0 : i1 to i32
    %c0_i32_0 = arith.constant 0 : i32
    %2 = arith.cmpi ne, %1, %c0_i32_0 : i32
    scf.if %2 {
      %c0_139 = arith.constant 0 : index
      %c0_140 = arith.constant 0 : index
      %327 = vector.load %arg5[%c0_139, %c0_140] : memref<2x32xf32, #tpu.memory_space<vmem>>, vector<2x32xf32>
      %c0_141 = arith.constant 0 : index
      %c0_142 = arith.constant 0 : index
      %328 = vector.load %arg11[%c0_141, %c0_142] : memref<2x32xf32, #tpu.memory_space<vmem>>, vector<2x32xf32>
      tpu.vector_store %arg11[%c0_141, %c0_142], %327 {strides = array<i32>} : memref<2x32xf32, #tpu.memory_space<vmem>>, vector<2x32xf32>,
      %c0_143 = arith.constant 0 : index
      %c0_144 = arith.constant 0 : index
      %329 = vector.load %arg6[%c0_143, %c0_144] : memref<2x32xf32, #tpu.memory_space<vmem>>, vector<2x32xf32>
      %c0_145 = arith.constant 0 : index
      %c0_146 = arith.constant 0 : index
      %330 = vector.load %arg12[%c0_145, %c0_146] : memref<2x32xf32, #tpu.memory_space<vmem>>, vector<2x32xf32>
      tpu.vector_store %arg12[%c0_145, %c0_146], %329 {strides = array<i32>} : memref<2x32xf32, #tpu.memory_space<vmem>>, vector<2x32xf32>,
    } else {
    }
    %c0 = arith.constant 0 : index
    %c0_1 = arith.constant 0 : index
    %3 = vector.load %arg5[%c0, %c0_1] : memref<2x32xf32, #tpu.memory_space<vmem>>, vector<2x32xf32>
    %c0_2 = arith.constant 0 : index
    %c0_3 = arith.constant 0 : index
    %4 = vector.load %arg6[%c0_2, %c0_3] : memref<2x32xf32, #tpu.memory_space<vmem>>, vector<2x32xf32>
    %c0_4 = arith.constant 0 : index
    %c0_5 = arith.constant 0 : index
    %5 = vector.load %arg7[%c0_4, %c0_5] : memref<2x32xf32, #tpu.memory_space<vmem>>, vector<2x32xf32>
    %c0_6 = arith.constant 0 : index
    %c0_7 = arith.constant 0 : index
    %c0_8 = arith.constant 0 : index
    %6 = vector.load %arg4[%c0_6, %c0_7, %c0_8] : memref<1x32x128xf32, #tpu.memory_space<vmem>>, vector<1x32x128xf32>
    %7 = vector.shape_cast %6 : vector<1x32x128xf32> to vector<32x128xf32>
    %c0_9 = arith.constant 0 : index
    %c0_10 = arith.constant 0 : index
    %8 = vector.load %arg11[%c0_9, %c0_10] : memref<2x32xf32, #tpu.memory_space<vmem>>, vector<2x32xf32>
    %c0_11 = arith.constant 0 : index
    %c0_12 = arith.constant 0 : index
    %9 = vector.load %arg12[%c0_11, %c0_12] : memref<2x32xf32, #tpu.memory_space<vmem>>, vector<2x32xf32>
    %c0_13 = arith.constant 0 : index
    %c0_14 = arith.constant 0 : index
    %c0_15 = arith.constant 0 : index
    %c0_16 = arith.constant 0 : index
    %10 = vector.load %arg2[%c0_13, %c0_14, %c0_15, %c0_16] : memref<1x8x2x128xf32, #tpu.memory_space<vmem>>, vector<1x1x2x128xf32>
    %11 = vector.shape_cast %10 : vector<1x1x2x128xf32> to vector<2x128xf32>
    %cst = arith.constant dense<0.000000e+00> : vector<2x128xf32>
    %12 = tpu.matmul %8, %7, %cst {dimension_numbers = #tpu.dot_dimension_numbers<[1], [0], [0], [1], [0, 0, 1, 1], [], []>} : vector<2x32xf32>, vector<32x128xf32>, vector<2x128xf32> -> vector<2x128xf32>
    %13 = arith.addf %11, %12 : vector<2x128xf32>
    %14 = arith.negf %13 : vector<2x128xf32>
    %15 = math.exp %14 : vector<2x128xf32>
    %cst_17 = arith.constant 1.000000e+00 : f32
    %16 = vector.broadcast %cst_17 : f32 to vector<2x128xf32>
    %17 = arith.addf %16, %15 : vector<2x128xf32>
    %18 = arith.divf %16, %17 : vector<2x128xf32>
    %19 = vector.extract_strided_slice %18 {offsets = [0, 0], sizes = [2, 32], strides = [1, 1]} : vector<2x128xf32> to vector<2x32xf32>
    %20 = vector.extract_strided_slice %18 {offsets = [0, 32], sizes = [2, 32], strides = [1, 1]} : vector<2x128xf32> to vector<2x32xf32>
    %21 = vector.extract_strided_slice %18 {offsets = [0, 96], sizes = [2, 32], strides = [1, 1]} : vector<2x128xf32> to vector<2x32xf32>
    %22 = vector.extract_strided_slice %13 {offsets = [0, 64], sizes = [2, 32], strides = [1, 1]} : vector<2x128xf32> to vector<2x32xf32>
    %23 = math.tanh %22 : vector<2x32xf32>
    %24 = arith.mulf %20, %9 : vector<2x32xf32>
    %25 = arith.mulf %19, %23 : vector<2x32xf32>
    %26 = arith.addf %24, %25 : vector<2x32xf32>
    %27 = math.tanh %26 : vector<2x32xf32>
    %28 = arith.mulf %21, %27 : vector<2x32xf32>
    %c0_18 = arith.constant 0 : index
    %c0_19 = arith.constant 0 : index
    %c0_20 = arith.constant 0 : index
    %c0_21 = arith.constant 0 : index
    %29 = vector.load %arg3[%c0_18, %c0_19, %c0_20, %c0_21] : memref<1x8x2x1xf32, #tpu.memory_space<vmem>>, vector<1x1x2x1xf32>
    %30 = vector.shape_cast %29 : vector<1x1x2x1xf32> to vector<2x1xf32>
    %31 = vector.broadcast %30 : vector<2x1xf32> to vector<2x32xf32>
    %32 = arith.mulf %28, %31 : vector<2x32xf32>
    %cst_22 = arith.constant 1.000000e+00 : f32
    %33 = vector.broadcast %cst_22 : f32 to vector<2x1xf32>
    %34 = arith.subf %33, %30 : vector<2x1xf32>
    %35 = vector.broadcast %34 : vector<2x1xf32> to vector<2x32xf32>
    %36 = arith.mulf %3, %35 : vector<2x32xf32>
    %37 = arith.addf %32, %36 : vector<2x32xf32>
    %38 = vector.broadcast %30 : vector<2x1xf32> to vector<2x32xf32>
    %39 = arith.mulf %26, %38 : vector<2x32xf32>
    %cst_23 = arith.constant 1.000000e+00 : f32
    %40 = vector.broadcast %cst_23 : f32 to vector<2x1xf32>
    %41 = arith.subf %40, %30 : vector<2x1xf32>
    %42 = vector.broadcast %41 : vector<2x1xf32> to vector<2x32xf32>
    %43 = arith.mulf %4, %42 : vector<2x32xf32>
    %44 = arith.addf %39, %43 : vector<2x32xf32>
    %c0_24 = arith.constant 0 : index
    %c0_25 = arith.constant 0 : index
    %c0_26 = arith.constant 0 : index
    %c0_27 = arith.constant 0 : index
    %45 = vector.load %arg8[%c0_24, %c0_25, %c0_26, %c0_27] : memref<1x8x2x32xf32, #tpu.memory_space<vmem>>, vector<1x1x2x32xf32>
    %46 = vector.shape_cast %45 : vector<1x1x2x32xf32> to vector<2x32xf32>
    %47 = vector.shape_cast %37 : vector<2x32xf32> to vector<1x1x2x32xf32>
    tpu.vector_store %arg8[%c0_24, %c0_25, %c0_26, %c0_27], %47 {strides = array<i32>} : memref<1x8x2x32xf32, #tpu.memory_space<vmem>>, vector<1x1x2x32xf32>,
    %48 = arith.mulf %37, %5 : vector<2x32xf32>
    %c0_28 = arith.constant 0 : index
    %c1 = arith.constant 1 : index
    %c0_29 = arith.constant 0 : index
    %c0_30 = arith.constant 0 : index
    %49 = vector.load %arg2[%c0_28, %c1, %c0_29, %c0_30] : memref<1x8x2x128xf32, #tpu.memory_space<vmem>>, vector<1x1x2x128xf32>
    %50 = vector.shape_cast %49 : vector<1x1x2x128xf32> to vector<2x128xf32>
    %cst_31 = arith.constant dense<0.000000e+00> : vector<2x128xf32>
    %51 = tpu.matmul %48, %7, %cst_31 {dimension_numbers = #tpu.dot_dimension_numbers<[1], [0], [0], [1], [0, 0, 1, 1], [], []>} : vector<2x32xf32>, vector<32x128xf32>, vector<2x128xf32> -> vector<2x128xf32>
    %52 = arith.addf %50, %51 : vector<2x128xf32>
    %53 = arith.negf %52 : vector<2x128xf32>
    %54 = math.exp %53 : vector<2x128xf32>
    %cst_32 = arith.constant 1.000000e+00 : f32
    %55 = vector.broadcast %cst_32 : f32 to vector<2x128xf32>
    %56 = arith.addf %55, %54 : vector<2x128xf32>
    %57 = arith.divf %55, %56 : vector<2x128xf32>
    %58 = vector.extract_strided_slice %57 {offsets = [0, 0], sizes = [2, 32], strides = [1, 1]} : vector<2x128xf32> to vector<2x32xf32>
    %59 = vector.extract_strided_slice %57 {offsets = [0, 32], sizes = [2, 32], strides = [1, 1]} : vector<2x128xf32> to vector<2x32xf32>
    %60 = vector.extract_strided_slice %57 {offsets = [0, 96], sizes = [2, 32], strides = [1, 1]} : vector<2x128xf32> to vector<2x32xf32>
    %61 = vector.extract_strided_slice %52 {offsets = [0, 64], sizes = [2, 32], strides = [1, 1]} : vector<2x128xf32> to vector<2x32xf32>
    %62 = math.tanh %61 : vector<2x32xf32>
    %63 = arith.mulf %59, %44 : vector<2x32xf32>
    %64 = arith.mulf %58, %62 : vector<2x32xf32>
    %65 = arith.addf %63, %64 : vector<2x32xf32>
    %66 = math.tanh %65 : vector<2x32xf32>
    %67 = arith.mulf %60, %66 : vector<2x32xf32>
    %c0_33 = arith.constant 0 : index
    %c1_34 = arith.constant 1 : index
    %c0_35 = arith.constant 0 : index
    %c0_36 = arith.constant 0 : index
    %68 = vector.load %arg3[%c0_33, %c1_34, %c0_35, %c0_36] : memref<1x8x2x1xf32, #tpu.memory_space<vmem>>, vector<1x1x2x1xf32>
    %69 = vector.shape_cast %68 : vector<1x1x2x1xf32> to vector<2x1xf32>
    %70 = vector.broadcast %69 : vector<2x1xf32> to vector<2x32xf32>
    %71 = arith.mulf %67, %70 : vector<2x32xf32>
    %cst_37 = arith.constant 1.000000e+00 : f32
    %72 = vector.broadcast %cst_37 : f32 to vector<2x1xf32>
    %73 = arith.subf %72, %69 : vector<2x1xf32>
    %74 = vector.broadcast %73 : vector<2x1xf32> to vector<2x32xf32>
    %75 = arith.mulf %3, %74 : vector<2x32xf32>
    %76 = arith.addf %71, %75 : vector<2x32xf32>
    %77 = vector.broadcast %69 : vector<2x1xf32> to vector<2x32xf32>
    %78 = arith.mulf %65, %77 : vector<2x32xf32>
    %cst_38 = arith.constant 1.000000e+00 : f32
    %79 = vector.broadcast %cst_38 : f32 to vector<2x1xf32>
    %80 = arith.subf %79, %69 : vector<2x1xf32>
    %81 = vector.broadcast %80 : vector<2x1xf32> to vector<2x32xf32>
    %82 = arith.mulf %4, %81 : vector<2x32xf32>
    %83 = arith.addf %78, %82 : vector<2x32xf32>
    %c0_39 = arith.constant 0 : index
    %c1_40 = arith.constant 1 : index
    %c0_41 = arith.constant 0 : index
    %c0_42 = arith.constant 0 : index
    %84 = vector.load %arg8[%c0_39, %c1_40, %c0_41, %c0_42] : memref<1x8x2x32xf32, #tpu.memory_space<vmem>>, vector<1x1x2x32xf32>
    %85 = vector.shape_cast %84 : vector<1x1x2x32xf32> to vector<2x32xf32>
    %86 = vector.shape_cast %76 : vector<2x32xf32> to vector<1x1x2x32xf32>
    tpu.vector_store %arg8[%c0_39, %c1_40, %c0_41, %c0_42], %86 {strides = array<i32>} : memref<1x8x2x32xf32, #tpu.memory_space<vmem>>, vector<1x1x2x32xf32>,
    %87 = arith.mulf %76, %5 : vector<2x32xf32>
    %c0_43 = arith.constant 0 : index
    %c2 = arith.constant 2 : index
    %c0_44 = arith.constant 0 : index
    %c0_45 = arith.constant 0 : index
    %88 = vector.load %arg2[%c0_43, %c2, %c0_44, %c0_45] : memref<1x8x2x128xf32, #tpu.memory_space<vmem>>, vector<1x1x2x128xf32>
    %89 = vector.shape_cast %88 : vector<1x1x2x128xf32> to vector<2x128xf32>
    %cst_46 = arith.constant dense<0.000000e+00> : vector<2x128xf32>
    %90 = tpu.matmul %87, %7, %cst_46 {dimension_numbers = #tpu.dot_dimension_numbers<[1], [0], [0], [1], [0, 0, 1, 1], [], []>} : vector<2x32xf32>, vector<32x128xf32>, vector<2x128xf32> -> vector<2x128xf32>
    %91 = arith.addf %89, %90 : vector<2x128xf32>
    %92 = arith.negf %91 : vector<2x128xf32>
    %93 = math.exp %92 : vector<2x128xf32>
    %cst_47 = arith.constant 1.000000e+00 : f32
    %94 = vector.broadcast %cst_47 : f32 to vector<2x128xf32>
    %95 = arith.addf %94, %93 : vector<2x128xf32>
    %96 = arith.divf %94, %95 : vector<2x128xf32>
    %97 = vector.extract_strided_slice %96 {offsets = [0, 0], sizes = [2, 32], strides = [1, 1]} : vector<2x128xf32> to vector<2x32xf32>
    %98 = vector.extract_strided_slice %96 {offsets = [0, 32], sizes = [2, 32], strides = [1, 1]} : vector<2x128xf32> to vector<2x32xf32>
    %99 = vector.extract_strided_slice %96 {offsets = [0, 96], sizes = [2, 32], strides = [1, 1]} : vector<2x128xf32> to vector<2x32xf32>
    %100 = vector.extract_strided_slice %91 {offsets = [0, 64], sizes = [2, 32], strides = [1, 1]} : vector<2x128xf32> to vector<2x32xf32>
    %101 = math.tanh %100 : vector<2x32xf32>
    %102 = arith.mulf %98, %83 : vector<2x32xf32>
    %103 = arith.mulf %97, %101 : vector<2x32xf32>
    %104 = arith.addf %102, %103 : vector<2x32xf32>
    %105 = math.tanh %104 : vector<2x32xf32>
    %106 = arith.mulf %99, %105 : vector<2x32xf32>
    %c0_48 = arith.constant 0 : index
    %c2_49 = arith.constant 2 : index
    %c0_50 = arith.constant 0 : index
    %c0_51 = arith.constant 0 : index
    %107 = vector.load %arg3[%c0_48, %c2_49, %c0_50, %c0_51] : memref<1x8x2x1xf32, #tpu.memory_space<vmem>>, vector<1x1x2x1xf32>
    %108 = vector.shape_cast %107 : vector<1x1x2x1xf32> to vector<2x1xf32>
    %109 = vector.broadcast %108 : vector<2x1xf32> to vector<2x32xf32>
    %110 = arith.mulf %106, %109 : vector<2x32xf32>
    %cst_52 = arith.constant 1.000000e+00 : f32
    %111 = vector.broadcast %cst_52 : f32 to vector<2x1xf32>
    %112 = arith.subf %111, %108 : vector<2x1xf32>
    %113 = vector.broadcast %112 : vector<2x1xf32> to vector<2x32xf32>
    %114 = arith.mulf %3, %113 : vector<2x32xf32>
    %115 = arith.addf %110, %114 : vector<2x32xf32>
    %116 = vector.broadcast %108 : vector<2x1xf32> to vector<2x32xf32>
    %117 = arith.mulf %104, %116 : vector<2x32xf32>
    %cst_53 = arith.constant 1.000000e+00 : f32
    %118 = vector.broadcast %cst_53 : f32 to vector<2x1xf32>
    %119 = arith.subf %118, %108 : vector<2x1xf32>
    %120 = vector.broadcast %119 : vector<2x1xf32> to vector<2x32xf32>
    %121 = arith.mulf %4, %120 : vector<2x32xf32>
    %122 = arith.addf %117, %121 : vector<2x32xf32>
    %c0_54 = arith.constant 0 : index
    %c2_55 = arith.constant 2 : index
    %c0_56 = arith.constant 0 : index
    %c0_57 = arith.constant 0 : index
    %123 = vector.load %arg8[%c0_54, %c2_55, %c0_56, %c0_57] : memref<1x8x2x32xf32, #tpu.memory_space<vmem>>, vector<1x1x2x32xf32>
    %124 = vector.shape_cast %123 : vector<1x1x2x32xf32> to vector<2x32xf32>
    %125 = vector.shape_cast %115 : vector<2x32xf32> to vector<1x1x2x32xf32>
    tpu.vector_store %arg8[%c0_54, %c2_55, %c0_56, %c0_57], %125 {strides = array<i32>} : memref<1x8x2x32xf32, #tpu.memory_space<vmem>>, vector<1x1x2x32xf32>,
    %126 = arith.mulf %115, %5 : vector<2x32xf32>
    %c0_58 = arith.constant 0 : index
    %c3 = arith.constant 3 : index
    %c0_59 = arith.constant 0 : index
    %c0_60 = arith.constant 0 : index
    %127 = vector.load %arg2[%c0_58, %c3, %c0_59, %c0_60] : memref<1x8x2x128xf32, #tpu.memory_space<vmem>>, vector<1x1x2x128xf32>
    %128 = vector.shape_cast %127 : vector<1x1x2x128xf32> to vector<2x128xf32>
    %cst_61 = arith.constant dense<0.000000e+00> : vector<2x128xf32>
    %129 = tpu.matmul %126, %7, %cst_61 {dimension_numbers = #tpu.dot_dimension_numbers<[1], [0], [0], [1], [0, 0, 1, 1], [], []>} : vector<2x32xf32>, vector<32x128xf32>, vector<2x128xf32> -> vector<2x128xf32>
    %130 = arith.addf %128, %129 : vector<2x128xf32>
    %131 = arith.negf %130 : vector<2x128xf32>
    %132 = math.exp %131 : vector<2x128xf32>
    %cst_62 = arith.constant 1.000000e+00 : f32
    %133 = vector.broadcast %cst_62 : f32 to vector<2x128xf32>
    %134 = arith.addf %133, %132 : vector<2x128xf32>
    %135 = arith.divf %133, %134 : vector<2x128xf32>
    %136 = vector.extract_strided_slice %135 {offsets = [0, 0], sizes = [2, 32], strides = [1, 1]} : vector<2x128xf32> to vector<2x32xf32>
    %137 = vector.extract_strided_slice %135 {offsets = [0, 32], sizes = [2, 32], strides = [1, 1]} : vector<2x128xf32> to vector<2x32xf32>
    %138 = vector.extract_strided_slice %135 {offsets = [0, 96], sizes = [2, 32], strides = [1, 1]} : vector<2x128xf32> to vector<2x32xf32>
    %139 = vector.extract_strided_slice %130 {offsets = [0, 64], sizes = [2, 32], strides = [1, 1]} : vector<2x128xf32> to vector<2x32xf32>
    %140 = math.tanh %139 : vector<2x32xf32>
    %141 = arith.mulf %137, %122 : vector<2x32xf32>
    %142 = arith.mulf %136, %140 : vector<2x32xf32>
    %143 = arith.addf %141, %142 : vector<2x32xf32>
    %144 = math.tanh %143 : vector<2x32xf32>
    %145 = arith.mulf %138, %144 : vector<2x32xf32>
    %c0_63 = arith.constant 0 : index
    %c3_64 = arith.constant 3 : index
    %c0_65 = arith.constant 0 : index
    %c0_66 = arith.constant 0 : index
    %146 = vector.load %arg3[%c0_63, %c3_64, %c0_65, %c0_66] : memref<1x8x2x1xf32, #tpu.memory_space<vmem>>, vector<1x1x2x1xf32>
    %147 = vector.shape_cast %146 : vector<1x1x2x1xf32> to vector<2x1xf32>
    %148 = vector.broadcast %147 : vector<2x1xf32> to vector<2x32xf32>
    %149 = arith.mulf %145, %148 : vector<2x32xf32>
    %cst_67 = arith.constant 1.000000e+00 : f32
    %150 = vector.broadcast %cst_67 : f32 to vector<2x1xf32>
    %151 = arith.subf %150, %147 : vector<2x1xf32>
    %152 = vector.broadcast %151 : vector<2x1xf32> to vector<2x32xf32>
    %153 = arith.mulf %3, %152 : vector<2x32xf32>
    %154 = arith.addf %149, %153 : vector<2x32xf32>
    %155 = vector.broadcast %147 : vector<2x1xf32> to vector<2x32xf32>
    %156 = arith.mulf %143, %155 : vector<2x32xf32>
    %cst_68 = arith.constant 1.000000e+00 : f32
    %157 = vector.broadcast %cst_68 : f32 to vector<2x1xf32>
    %158 = arith.subf %157, %147 : vector<2x1xf32>
    %159 = vector.broadcast %158 : vector<2x1xf32> to vector<2x32xf32>
    %160 = arith.mulf %4, %159 : vector<2x32xf32>
    %161 = arith.addf %156, %160 : vector<2x32xf32>
    %c0_69 = arith.constant 0 : index
    %c3_70 = arith.constant 3 : index
    %c0_71 = arith.constant 0 : index
    %c0_72 = arith.constant 0 : index
    %162 = vector.load %arg8[%c0_69, %c3_70, %c0_71, %c0_72] : memref<1x8x2x32xf32, #tpu.memory_space<vmem>>, vector<1x1x2x32xf32>
    %163 = vector.shape_cast %162 : vector<1x1x2x32xf32> to vector<2x32xf32>
    %164 = vector.shape_cast %154 : vector<2x32xf32> to vector<1x1x2x32xf32>
    tpu.vector_store %arg8[%c0_69, %c3_70, %c0_71, %c0_72], %164 {strides = array<i32>} : memref<1x8x2x32xf32, #tpu.memory_space<vmem>>, vector<1x1x2x32xf32>,
    %165 = arith.mulf %154, %5 : vector<2x32xf32>
    %c0_73 = arith.constant 0 : index
    %c4 = arith.constant 4 : index
    %c0_74 = arith.constant 0 : index
    %c0_75 = arith.constant 0 : index
    %166 = vector.load %arg2[%c0_73, %c4, %c0_74, %c0_75] : memref<1x8x2x128xf32, #tpu.memory_space<vmem>>, vector<1x1x2x128xf32>
    %167 = vector.shape_cast %166 : vector<1x1x2x128xf32> to vector<2x128xf32>
    %cst_76 = arith.constant dense<0.000000e+00> : vector<2x128xf32>
    %168 = tpu.matmul %165, %7, %cst_76 {dimension_numbers = #tpu.dot_dimension_numbers<[1], [0], [0], [1], [0, 0, 1, 1], [], []>} : vector<2x32xf32>, vector<32x128xf32>, vector<2x128xf32> -> vector<2x128xf32>
    %169 = arith.addf %167, %168 : vector<2x128xf32>
    %170 = arith.negf %169 : vector<2x128xf32>
    %171 = math.exp %170 : vector<2x128xf32>
    %cst_77 = arith.constant 1.000000e+00 : f32
    %172 = vector.broadcast %cst_77 : f32 to vector<2x128xf32>
    %173 = arith.addf %172, %171 : vector<2x128xf32>
    %174 = arith.divf %172, %173 : vector<2x128xf32>
    %175 = vector.extract_strided_slice %174 {offsets = [0, 0], sizes = [2, 32], strides = [1, 1]} : vector<2x128xf32> to vector<2x32xf32>
    %176 = vector.extract_strided_slice %174 {offsets = [0, 32], sizes = [2, 32], strides = [1, 1]} : vector<2x128xf32> to vector<2x32xf32>
    %177 = vector.extract_strided_slice %174 {offsets = [0, 96], sizes = [2, 32], strides = [1, 1]} : vector<2x128xf32> to vector<2x32xf32>
    %178 = vector.extract_strided_slice %169 {offsets = [0, 64], sizes = [2, 32], strides = [1, 1]} : vector<2x128xf32> to vector<2x32xf32>
    %179 = math.tanh %178 : vector<2x32xf32>
    %180 = arith.mulf %176, %161 : vector<2x32xf32>
    %181 = arith.mulf %175, %179 : vector<2x32xf32>
    %182 = arith.addf %180, %181 : vector<2x32xf32>
    %183 = math.tanh %182 : vector<2x32xf32>
    %184 = arith.mulf %177, %183 : vector<2x32xf32>
    %c0_78 = arith.constant 0 : index
    %c4_79 = arith.constant 4 : index
    %c0_80 = arith.constant 0 : index
    %c0_81 = arith.constant 0 : index
    %185 = vector.load %arg3[%c0_78, %c4_79, %c0_80, %c0_81] : memref<1x8x2x1xf32, #tpu.memory_space<vmem>>, vector<1x1x2x1xf32>
    %186 = vector.shape_cast %185 : vector<1x1x2x1xf32> to vector<2x1xf32>
    %187 = vector.broadcast %186 : vector<2x1xf32> to vector<2x32xf32>
    %188 = arith.mulf %184, %187 : vector<2x32xf32>
    %cst_82 = arith.constant 1.000000e+00 : f32
    %189 = vector.broadcast %cst_82 : f32 to vector<2x1xf32>
    %190 = arith.subf %189, %186 : vector<2x1xf32>
    %191 = vector.broadcast %190 : vector<2x1xf32> to vector<2x32xf32>
    %192 = arith.mulf %3, %191 : vector<2x32xf32>
    %193 = arith.addf %188, %192 : vector<2x32xf32>
    %194 = vector.broadcast %186 : vector<2x1xf32> to vector<2x32xf32>
    %195 = arith.mulf %182, %194 : vector<2x32xf32>
    %cst_83 = arith.constant 1.000000e+00 : f32
    %196 = vector.broadcast %cst_83 : f32 to vector<2x1xf32>
    %197 = arith.subf %196, %186 : vector<2x1xf32>
    %198 = vector.broadcast %197 : vector<2x1xf32> to vector<2x32xf32>
    %199 = arith.mulf %4, %198 : vector<2x32xf32>
    %200 = arith.addf %195, %199 : vector<2x32xf32>
    %c0_84 = arith.constant 0 : index
    %c4_85 = arith.constant 4 : index
    %c0_86 = arith.constant 0 : index
    %c0_87 = arith.constant 0 : index
    %201 = vector.load %arg8[%c0_84, %c4_85, %c0_86, %c0_87] : memref<1x8x2x32xf32, #tpu.memory_space<vmem>>, vector<1x1x2x32xf32>
    %202 = vector.shape_cast %201 : vector<1x1x2x32xf32> to vector<2x32xf32>
    %203 = vector.shape_cast %193 : vector<2x32xf32> to vector<1x1x2x32xf32>
    tpu.vector_store %arg8[%c0_84, %c4_85, %c0_86, %c0_87], %203 {strides = array<i32>} : memref<1x8x2x32xf32, #tpu.memory_space<vmem>>, vector<1x1x2x32xf32>,
    %204 = arith.mulf %193, %5 : vector<2x32xf32>
    %c0_88 = arith.constant 0 : index
    %c5 = arith.constant 5 : index
    %c0_89 = arith.constant 0 : index
    %c0_90 = arith.constant 0 : index
    %205 = vector.load %arg2[%c0_88, %c5, %c0_89, %c0_90] : memref<1x8x2x128xf32, #tpu.memory_space<vmem>>, vector<1x1x2x128xf32>
    %206 = vector.shape_cast %205 : vector<1x1x2x128xf32> to vector<2x128xf32>
    %cst_91 = arith.constant dense<0.000000e+00> : vector<2x128xf32>
    %207 = tpu.matmul %204, %7, %cst_91 {dimension_numbers = #tpu.dot_dimension_numbers<[1], [0], [0], [1], [0, 0, 1, 1], [], []>} : vector<2x32xf32>, vector<32x128xf32>, vector<2x128xf32> -> vector<2x128xf32>
    %208 = arith.addf %206, %207 : vector<2x128xf32>
    %209 = arith.negf %208 : vector<2x128xf32>
    %210 = math.exp %209 : vector<2x128xf32>
    %cst_92 = arith.constant 1.000000e+00 : f32
    %211 = vector.broadcast %cst_92 : f32 to vector<2x128xf32>
    %212 = arith.addf %211, %210 : vector<2x128xf32>
    %213 = arith.divf %211, %212 : vector<2x128xf32>
    %214 = vector.extract_strided_slice %213 {offsets = [0, 0], sizes = [2, 32], strides = [1, 1]} : vector<2x128xf32> to vector<2x32xf32>
    %215 = vector.extract_strided_slice %213 {offsets = [0, 32], sizes = [2, 32], strides = [1, 1]} : vector<2x128xf32> to vector<2x32xf32>
    %216 = vector.extract_strided_slice %213 {offsets = [0, 96], sizes = [2, 32], strides = [1, 1]} : vector<2x128xf32> to vector<2x32xf32>
    %217 = vector.extract_strided_slice %208 {offsets = [0, 64], sizes = [2, 32], strides = [1, 1]} : vector<2x128xf32> to vector<2x32xf32>
    %218 = math.tanh %217 : vector<2x32xf32>
    %219 = arith.mulf %215, %200 : vector<2x32xf32>
    %220 = arith.mulf %214, %218 : vector<2x32xf32>
    %221 = arith.addf %219, %220 : vector<2x32xf32>
    %222 = math.tanh %221 : vector<2x32xf32>
    %223 = arith.mulf %216, %222 : vector<2x32xf32>
    %c0_93 = arith.constant 0 : index
    %c5_94 = arith.constant 5 : index
    %c0_95 = arith.constant 0 : index
    %c0_96 = arith.constant 0 : index
    %224 = vector.load %arg3[%c0_93, %c5_94, %c0_95, %c0_96] : memref<1x8x2x1xf32, #tpu.memory_space<vmem>>, vector<1x1x2x1xf32>
    %225 = vector.shape_cast %224 : vector<1x1x2x1xf32> to vector<2x1xf32>
    %226 = vector.broadcast %225 : vector<2x1xf32> to vector<2x32xf32>
    %227 = arith.mulf %223, %226 : vector<2x32xf32>
    %cst_97 = arith.constant 1.000000e+00 : f32
    %228 = vector.broadcast %cst_97 : f32 to vector<2x1xf32>
    %229 = arith.subf %228, %225 : vector<2x1xf32>
    %230 = vector.broadcast %229 : vector<2x1xf32> to vector<2x32xf32>
    %231 = arith.mulf %3, %230 : vector<2x32xf32>
    %232 = arith.addf %227, %231 : vector<2x32xf32>
    %233 = vector.broadcast %225 : vector<2x1xf32> to vector<2x32xf32>
    %234 = arith.mulf %221, %233 : vector<2x32xf32>
    %cst_98 = arith.constant 1.000000e+00 : f32
    %235 = vector.broadcast %cst_98 : f32 to vector<2x1xf32>
    %236 = arith.subf %235, %225 : vector<2x1xf32>
    %237 = vector.broadcast %236 : vector<2x1xf32> to vector<2x32xf32>
    %238 = arith.mulf %4, %237 : vector<2x32xf32>
    %239 = arith.addf %234, %238 : vector<2x32xf32>
    %c0_99 = arith.constant 0 : index
    %c5_100 = arith.constant 5 : index
    %c0_101 = arith.constant 0 : index
    %c0_102 = arith.constant 0 : index
    %240 = vector.load %arg8[%c0_99, %c5_100, %c0_101, %c0_102] : memref<1x8x2x32xf32, #tpu.memory_space<vmem>>, vector<1x1x2x32xf32>
    %241 = vector.shape_cast %240 : vector<1x1x2x32xf32> to vector<2x32xf32>
    %242 = vector.shape_cast %232 : vector<2x32xf32> to vector<1x1x2x32xf32>
    tpu.vector_store %arg8[%c0_99, %c5_100, %c0_101, %c0_102], %242 {strides = array<i32>} : memref<1x8x2x32xf32, #tpu.memory_space<vmem>>, vector<1x1x2x32xf32>,
    %243 = arith.mulf %232, %5 : vector<2x32xf32>
    %c0_103 = arith.constant 0 : index
    %c6 = arith.constant 6 : index
    %c0_104 = arith.constant 0 : index
    %c0_105 = arith.constant 0 : index
    %244 = vector.load %arg2[%c0_103, %c6, %c0_104, %c0_105] : memref<1x8x2x128xf32, #tpu.memory_space<vmem>>, vector<1x1x2x128xf32>
    %245 = vector.shape_cast %244 : vector<1x1x2x128xf32> to vector<2x128xf32>
    %cst_106 = arith.constant dense<0.000000e+00> : vector<2x128xf32>
    %246 = tpu.matmul %243, %7, %cst_106 {dimension_numbers = #tpu.dot_dimension_numbers<[1], [0], [0], [1], [0, 0, 1, 1], [], []>} : vector<2x32xf32>, vector<32x128xf32>, vector<2x128xf32> -> vector<2x128xf32>
    %247 = arith.addf %245, %246 : vector<2x128xf32>
    %248 = arith.negf %247 : vector<2x128xf32>
    %249 = math.exp %248 : vector<2x128xf32>
    %cst_107 = arith.constant 1.000000e+00 : f32
    %250 = vector.broadcast %cst_107 : f32 to vector<2x128xf32>
    %251 = arith.addf %250, %249 : vector<2x128xf32>
    %252 = arith.divf %250, %251 : vector<2x128xf32>
    %253 = vector.extract_strided_slice %252 {offsets = [0, 0], sizes = [2, 32], strides = [1, 1]} : vector<2x128xf32> to vector<2x32xf32>
    %254 = vector.extract_strided_slice %252 {offsets = [0, 32], sizes = [2, 32], strides = [1, 1]} : vector<2x128xf32> to vector<2x32xf32>
    %255 = vector.extract_strided_slice %252 {offsets = [0, 96], sizes = [2, 32], strides = [1, 1]} : vector<2x128xf32> to vector<2x32xf32>
    %256 = vector.extract_strided_slice %247 {offsets = [0, 64], sizes = [2, 32], strides = [1, 1]} : vector<2x128xf32> to vector<2x32xf32>
    %257 = math.tanh %256 : vector<2x32xf32>
    %258 = arith.mulf %254, %239 : vector<2x32xf32>
    %259 = arith.mulf %253, %257 : vector<2x32xf32>
    %260 = arith.addf %258, %259 : vector<2x32xf32>
    %261 = math.tanh %260 : vector<2x32xf32>
    %262 = arith.mulf %255, %261 : vector<2x32xf32>
    %c0_108 = arith.constant 0 : index
    %c6_109 = arith.constant 6 : index
    %c0_110 = arith.constant 0 : index
    %c0_111 = arith.constant 0 : index
    %263 = vector.load %arg3[%c0_108, %c6_109, %c0_110, %c0_111] : memref<1x8x2x1xf32, #tpu.memory_space<vmem>>, vector<1x1x2x1xf32>
    %264 = vector.shape_cast %263 : vector<1x1x2x1xf32> to vector<2x1xf32>
    %265 = vector.broadcast %264 : vector<2x1xf32> to vector<2x32xf32>
    %266 = arith.mulf %262, %265 : vector<2x32xf32>
    %cst_112 = arith.constant 1.000000e+00 : f32
    %267 = vector.broadcast %cst_112 : f32 to vector<2x1xf32>
    %268 = arith.subf %267, %264 : vector<2x1xf32>
    %269 = vector.broadcast %268 : vector<2x1xf32> to vector<2x32xf32>
    %270 = arith.mulf %3, %269 : vector<2x32xf32>
    %271 = arith.addf %266, %270 : vector<2x32xf32>
    %272 = vector.broadcast %264 : vector<2x1xf32> to vector<2x32xf32>
    %273 = arith.mulf %260, %272 : vector<2x32xf32>
    %cst_113 = arith.constant 1.000000e+00 : f32
    %274 = vector.broadcast %cst_113 : f32 to vector<2x1xf32>
    %275 = arith.subf %274, %264 : vector<2x1xf32>
    %276 = vector.broadcast %275 : vector<2x1xf32> to vector<2x32xf32>
    %277 = arith.mulf %4, %276 : vector<2x32xf32>
    %278 = arith.addf %273, %277 : vector<2x32xf32>
    %c0_114 = arith.constant 0 : index
    %c6_115 = arith.constant 6 : index
    %c0_116 = arith.constant 0 : index
    %c0_117 = arith.constant 0 : index
    %279 = vector.load %arg8[%c0_114, %c6_115, %c0_116, %c0_117] : memref<1x8x2x32xf32, #tpu.memory_space<vmem>>, vector<1x1x2x32xf32>
    %280 = vector.shape_cast %279 : vector<1x1x2x32xf32> to vector<2x32xf32>
    %281 = vector.shape_cast %271 : vector<2x32xf32> to vector<1x1x2x32xf32>
    tpu.vector_store %arg8[%c0_114, %c6_115, %c0_116, %c0_117], %281 {strides = array<i32>} : memref<1x8x2x32xf32, #tpu.memory_space<vmem>>, vector<1x1x2x32xf32>,
    %282 = arith.mulf %271, %5 : vector<2x32xf32>
    %c0_118 = arith.constant 0 : index
    %c7 = arith.constant 7 : index
    %c0_119 = arith.constant 0 : index
    %c0_120 = arith.constant 0 : index
    %283 = vector.load %arg2[%c0_118, %c7, %c0_119, %c0_120] : memref<1x8x2x128xf32, #tpu.memory_space<vmem>>, vector<1x1x2x128xf32>
    %284 = vector.shape_cast %283 : vector<1x1x2x128xf32> to vector<2x128xf32>
    %cst_121 = arith.constant dense<0.000000e+00> : vector<2x128xf32>
    %285 = tpu.matmul %282, %7, %cst_121 {dimension_numbers = #tpu.dot_dimension_numbers<[1], [0], [0], [1], [0, 0, 1, 1], [], []>} : vector<2x32xf32>, vector<32x128xf32>, vector<2x128xf32> -> vector<2x128xf32>
    %286 = arith.addf %284, %285 : vector<2x128xf32>
    %287 = arith.negf %286 : vector<2x128xf32>
    %288 = math.exp %287 : vector<2x128xf32>
    %cst_122 = arith.constant 1.000000e+00 : f32
    %289 = vector.broadcast %cst_122 : f32 to vector<2x128xf32>
    %290 = arith.addf %289, %288 : vector<2x128xf32>
    %291 = arith.divf %289, %290 : vector<2x128xf32>
    %292 = vector.extract_strided_slice %291 {offsets = [0, 0], sizes = [2, 32], strides = [1, 1]} : vector<2x128xf32> to vector<2x32xf32>
    %293 = vector.extract_strided_slice %291 {offsets = [0, 32], sizes = [2, 32], strides = [1, 1]} : vector<2x128xf32> to vector<2x32xf32>
    %294 = vector.extract_strided_slice %291 {offsets = [0, 96], sizes = [2, 32], strides = [1, 1]} : vector<2x128xf32> to vector<2x32xf32>
    %295 = vector.extract_strided_slice %286 {offsets = [0, 64], sizes = [2, 32], strides = [1, 1]} : vector<2x128xf32> to vector<2x32xf32>
    %296 = math.tanh %295 : vector<2x32xf32>
    %297 = arith.mulf %293, %278 : vector<2x32xf32>
    %298 = arith.mulf %292, %296 : vector<2x32xf32>
    %299 = arith.addf %297, %298 : vector<2x32xf32>
    %300 = math.tanh %299 : vector<2x32xf32>
    %301 = arith.mulf %294, %300 : vector<2x32xf32>
    %c0_123 = arith.constant 0 : index
    %c7_124 = arith.constant 7 : index
    %c0_125 = arith.constant 0 : index
    %c0_126 = arith.constant 0 : index
    %302 = vector.load %arg3[%c0_123, %c7_124, %c0_125, %c0_126] : memref<1x8x2x1xf32, #tpu.memory_space<vmem>>, vector<1x1x2x1xf32>
    %303 = vector.shape_cast %302 : vector<1x1x2x1xf32> to vector<2x1xf32>
    %304 = vector.broadcast %303 : vector<2x1xf32> to vector<2x32xf32>
    %305 = arith.mulf %301, %304 : vector<2x32xf32>
    %cst_127 = arith.constant 1.000000e+00 : f32
    %306 = vector.broadcast %cst_127 : f32 to vector<2x1xf32>
    %307 = arith.subf %306, %303 : vector<2x1xf32>
    %308 = vector.broadcast %307 : vector<2x1xf32> to vector<2x32xf32>
    %309 = arith.mulf %3, %308 : vector<2x32xf32>
    %310 = arith.addf %305, %309 : vector<2x32xf32>
    %311 = vector.broadcast %303 : vector<2x1xf32> to vector<2x32xf32>
    %312 = arith.mulf %299, %311 : vector<2x32xf32>
    %cst_128 = arith.constant 1.000000e+00 : f32
    %313 = vector.broadcast %cst_128 : f32 to vector<2x1xf32>
    %314 = arith.subf %313, %303 : vector<2x1xf32>
    %315 = vector.broadcast %314 : vector<2x1xf32> to vector<2x32xf32>
    %316 = arith.mulf %4, %315 : vector<2x32xf32>
    %317 = arith.addf %312, %316 : vector<2x32xf32>
    %c0_129 = arith.constant 0 : index
    %c7_130 = arith.constant 7 : index
    %c0_131 = arith.constant 0 : index
    %c0_132 = arith.constant 0 : index
    %318 = vector.load %arg8[%c0_129, %c7_130, %c0_131, %c0_132] : memref<1x8x2x32xf32, #tpu.memory_space<vmem>>, vector<1x1x2x32xf32>
    %319 = vector.shape_cast %318 : vector<1x1x2x32xf32> to vector<2x32xf32>
    %320 = vector.shape_cast %310 : vector<2x32xf32> to vector<1x1x2x32xf32>
    tpu.vector_store %arg8[%c0_129, %c7_130, %c0_131, %c0_132], %320 {strides = array<i32>} : memref<1x8x2x32xf32, #tpu.memory_space<vmem>>, vector<1x1x2x32xf32>,
    %321 = arith.mulf %310, %5 : vector<2x32xf32>
    %c0_133 = arith.constant 0 : index
    %c0_134 = arith.constant 0 : index
    %322 = vector.load %arg11[%c0_133, %c0_134] : memref<2x32xf32, #tpu.memory_space<vmem>>, vector<2x32xf32>
    tpu.vector_store %arg11[%c0_133, %c0_134], %321 {strides = array<i32>} : memref<2x32xf32, #tpu.memory_space<vmem>>, vector<2x32xf32>,
    %c0_135 = arith.constant 0 : index
    %c0_136 = arith.constant 0 : index
    %323 = vector.load %arg12[%c0_135, %c0_136] : memref<2x32xf32, #tpu.memory_space<vmem>>, vector<2x32xf32>
    tpu.vector_store %arg12[%c0_135, %c0_136], %317 {strides = array<i32>} : memref<2x32xf32, #tpu.memory_space<vmem>>, vector<2x32xf32>,
    %c0_i32_137 = arith.constant 0 : i32
    %324 = arith.cmpi eq, %arg1, %c0_i32_137 : i32
    %325 = arith.extui %324 : i1 to i32
    %c0_i32_138 = arith.constant 0 : i32
    %326 = arith.cmpi ne, %325, %c0_i32_138 : i32
    scf.if %326 {
      %c0_139 = arith.constant 0 : index
      %c0_140 = arith.constant 0 : index
      %327 = vector.load %arg11[%c0_139, %c0_140] : memref<2x32xf32, #tpu.memory_space<vmem>>, vector<2x32xf32>
      %c0_141 = arith.constant 0 : index
      %c0_142 = arith.constant 0 : index
      %c0_143 = arith.constant 0 : index
      %328 = vector.load %arg9[%c0_141, %c0_142, %c0_143] : memref<1x2x32xf32, #tpu.memory_space<vmem>>, vector<1x2x32xf32>
      %329 = vector.shape_cast %328 : vector<1x2x32xf32> to vector<2x32xf32>
      %330 = vector.shape_cast %327 : vector<2x32xf32> to vector<1x2x32xf32>
      tpu.vector_store %arg9[%c0_141, %c0_142, %c0_143], %330 {strides = array<i32>} : memref<1x2x32xf32, #tpu.memory_space<vmem>>, vector<1x2x32xf32>,
      %c0_144 = arith.constant 0 : index
      %c0_145 = arith.constant 0 : index
      %331 = vector.load %arg12[%c0_144, %c0_145] : memref<2x32xf32, #tpu.memory_space<vmem>>, vector<2x32xf32>
      %c0_146 = arith.constant 0 : index
      %c0_147 = arith.constant 0 : index
      %c0_148 = arith.constant 0 : index
      %332 = vector.load %arg10[%c0_146, %c0_147, %c0_148] : memref<1x2x32xf32, #tpu.memory_space<vmem>>, vector<1x2x32xf32>
      %333 = vector.shape_cast %332 : vector<1x2x32xf32> to vector<2x32xf32>
      %334 = vector.shape_cast %331 : vector<2x32xf32> to vector<1x2x32xf32>
      tpu.vector_store %arg10[%c0_146, %c0_147, %c0_148], %334 {strides = array<i32>} : memref<1x2x32xf32, #tpu.memory_space<vmem>>, vector<1x2x32xf32>,
    } else {
    }
    return
  }
  func.func @transform_0(%arg0: i32, %arg1: i32) -> (i32, i32, i32, i32) {
    %c0_i32 = arith.constant 0 : i32
    %c0_i32_0 = arith.constant 0 : i32
    %c0_i32_1 = arith.constant 0 : i32
    return %arg0, %arg1, %c0_i32, %c0_i32_0 : i32, i32, i32, i32
  }
  func.func @transform_1(%arg0: i32, %arg1: i32) -> (i32, i32, i32, i32) {
    %c0_i32 = arith.constant 0 : i32
    %c0_i32_0 = arith.constant 0 : i32
    %c0_i32_1 = arith.constant 0 : i32
    return %arg0, %arg1, %c0_i32, %c0_i32_0 : i32, i32, i32, i32
  }
  func.func @transform_2(%arg0: i32, %arg1: i32) -> (i32, i32, i32) {
    %c0_i32 = arith.constant 0 : i32
    %c0_i32_0 = arith.constant 0 : i32
    %c0_i32_1 = arith.constant 0 : i32
    return %arg0, %c0_i32, %c0_i32_0 : i32, i32, i32
  }
  func.func @transform_3(%arg0: i32, %arg1: i32) -> (i32, i32) {
    %c0_i32 = arith.constant 0 : i32
    %c0_i32_0 = arith.constant 0 : i32
    %c0_i32_1 = arith.constant 0 : i32
    return %c0_i32, %c0_i32_0 : i32, i32
  }
  func.func @transform_4(%arg0: i32, %arg1: i32) -> (i32, i32) {
    %c0_i32 = arith.constant 0 : i32
    %c0_i32_0 = arith.constant 0 : i32
    %c0_i32_1 = arith.constant 0 : i32
    return %c0_i32, %c0_i32_0 : i32, i32
  }
  func.func @transform_5(%arg0: i32, %arg1: i32) -> (i32, i32) {
    %c0_i32 = arith.constant 0 : i32
    %c0_i32_0 = arith.constant 0 : i32
    %c0_i32_1 = arith.constant 0 : i32
    return %c0_i32, %c0_i32_0 : i32, i32
  }
  func.func @transform_6(%arg0: i32, %arg1: i32) -> (i32, i32, i32, i32) {
    %c0_i32 = arith.constant 0 : i32
    %c0_i32_0 = arith.constant 0 : i32
    %c0_i32_1 = arith.constant 0 : i32
    return %arg0, %arg1, %c0_i32, %c0_i32_0 : i32, i32, i32, i32
  }
  func.func @transform_7(%arg0: i32, %arg1: i32) -> (i32, i32, i32) {
    %c0_i32 = arith.constant 0 : i32
    %c0_i32_0 = arith.constant 0 : i32
    %c0_i32_1 = arith.constant 0 : i32
    return %arg0, %c0_i32, %c0_i32_0 : i32, i32, i32
  }
  func.func @transform_8(%arg0: i32, %arg1: i32) -> (i32, i32, i32) {
    %c0_i32 = arith.constant 0 : i32
    %c0_i32_0 = arith.constant 0 : i32
    %c0_i32_1 = arith.constant 0 : i32
    return %arg0, %c0_i32, %c0_i32_0 : i32, i32, i32
  }
}

</mosaic_0001>

<bundles_post_ra>
// kernel: tpu_custom_call.1
= control target key start
LH: loop header
LB: loop body
LE: loop exit
PB: predicated region body
PF: predicated region fallthrough
CT: control target
= control target key end

     0   :  { %s2854_s0 = inlined_call_operand.vmem [shape: f32[2,8,2,128], index: 0, kind: input, shape index: {}]   ;;  %s2855_s1 = inlined_call_operand.vmem [shape: f32[2,8,2,1], index: 1, kind: input, shape index: {}]   ;;  %s2856_s2 = inlined_call_operand.hbm [shape: f32[2,32,128], index: 2, kind: input, shape index: {}]   ;;  %s2857_s3 = inlined_call_operand.vmem [shape: f32[2,32], index: 3, kind: input, shape index: {}]   ;;  %s2858_s4 = inlined_call_operand.vmem [shape: f32[2,32], index: 4, kind: input, shape index: {}]   ;;  %s2859_s5 = inlined_call_operand.vmem [shape: f32[2,32], index: 5, kind: input, shape index: {}]   ;;  %s2860_s6 = inlined_call_operand.hbm [shape: f32[2,8,2,32], index: 6, kind: output, shape index: {0}]   ;;  %s2861_s7 = inlined_call_operand.hbm [shape: f32[2,2,32], index: 7, kind: output, shape index: {1}]   ;;  %s2862_s8 = inlined_call_operand.hbm [shape: f32[2,2,32], index: 8, kind: output, shape index: {2}]  }
   0x1   :  { %2867 = sst [smem:[#allocation17_spill]] %s2854_s0 }
   0x2   :  { %14 = vsyncpa [#allocation5], 0 }
   0x3   :  { %16 = vsyncpa [#allocation5 + $0x1], 0 }
   0x4   :  { %17 = vsyncpa [#allocation6], 0 }
   0x5   :  { %19 = vsyncpa [#allocation6 + $0x1], 0 }
   0x6   :  { %20 = vsyncpa [#allocation9], 0 }
   0x7   :  { %22 = vsyncpa [#allocation9 + $0x1], 0  ;;  %s2355_s27 = smov 0   ;;  %s2357_s28 = smov 0  }
   0x8   :  { %s2359_s29 = smov 0   ;;  %s2361_s30 = smov 0  }
   0x9   :  { %s2363_s9 = smov 0   ;;  %s2365_s10 = smov 0  }
   0xa LB: > { %2868 = sst [smem:[#allocation14_spill]] %s2291_s9  ;;  %s2386_s11 = sadd.s32 4294967295, %s2295_s10   ;;  %s2295_s10 = sphi %s2365_s10, %s28_s10   ;;  %s2291_s9 = sphi %s2363_s9, %s2888_s9   ;;  %s2287_s30 = sphi %s2361_s30, %s2883_s30   ;;  %s2283_s29 = sphi %s2359_s29, %s2887_s29   ;;  %s2279_s28 = sphi %s2357_s28, %s2886_s28   ;;  %s2275_s27 = sphi %s2355_s27, %s2885_s27  }
   0xb   : > { %s2864_s12 = sadd.s32 4294967294, %s2295_s10   ;;  %s40_s13 = sadd.s32 1, %s2291_s9 }
   0xc   : > { %s103_s14 = sadd.s32 1, %s2283_s29  ;;  %p42_p0 = scmp.ge.s32.totalorder %s40_s13, 2 }
   0xd   : > { %p110_p1 = scmp.ne.s32.totalorder %s2283_s29, %s2279_s28  ;;  %p111_p2 = scmp.eq.s32.totalorder %s2295_s10, 0 }
   0xe   : > { %p116_p3 = scmp.ne.s32.totalorder %s2279_s28, %s2275_s27  ;;  %s2890_s13 = smov (%p42_p0, %s40_s13), 0 }
   0xf   : > { %2869 = sst [smem:[#allocation15_spill]] %s2890_s13  ;;  %p2398_p4 = por %p111_p2, %p110_p1 }
  0x10   : > { %p117_p5 = scmp.eq.s32.totalorder %s2386_s11, 0  ;;  %s100_s16 = ssub.s32 %s2291_s9, %s2890_s13 }
  0x11   : > { %p205_p6 = scmp.eq.s32.totalorder %s2386_s11, 1  ;;  %p101_p7 = scmp.eq.s32.totalorder %s100_s16, 0 }
  0x12   : > { %p2406_p8 = por %p117_p5, %p116_p3  ;;  %p211_p10 = scmp.eq.s32.totalorder %s2864_s12, 1 }
  0x13   : > { %p2410_p9 = por %p205_p6, %p110_p1  ;;  %p2006_p13 = scmp.lt.s32.totalorder %s2295_s10, 2 }
  0x14   : > { %s2417_s19 = scalar_select %p101_p7, %s2283_s29, %s103_s14  }
  0x15   : > { %p2419_p11 = por %p211_p10, %p116_p3  ;;  %s318_s21 = sand.u32 1, %s2283_s29  }
  0x16   : > { %2873 = sst [smem:[#allocation16_spill]] %s2417_s19  ;;  %s1794_s22 = sshll.u32 %s318_s21, 5 }
  0x17   : > { %s1852_s23 = sshll.u32 %s2291_s9, 9  ;;  %s322_s16 = scalar_lea.vmem [#allocation4], %s1794_s22 }
  0x18   : > { %s328_s26 = scalar_lea.hbm %s2856_s2, %s1852_s23  ;;  %s329_s13 = sshll.u32 %s322_s16, 4  ;;  %s330_s13 = int_to_ptr.vmem [resolvable:$true] %s329_s13 }
  0x19   : > { %p2432_p0 = pnand %p2006_p13, %p2398_p4  ;;  %p1797_p1 = scmp.ge.s32.totalorder %s2295_s10, 1 }
  0x1a   : > { %s319_s12 = scalar_lea.sflag [#allocation5], %s318_s21  ;;  %s2144_s19 = scalar_lea.vmem %s330_s13, 512 }
  0x1b   : > { %p2133_p2 = pneg %p2432_p0  ;;  %p2145_p3 = scmp.ne.s32.totalorder %s330_s13, %s2144_s19 }
  0x1c   : > { %s2297_s9 = smov [#allocation4]  }
  0x1d   : > { %p2147_p5 = pnand %p2145_p3, %p2133_p2  ;;  %s2149_s24 = sshll.u32 %s2297_s9, 4  ;;  %s2150_s24 = int_to_ptr.vmem [resolvable:$false] %s2149_s24 }
  0x1e   : > { %s2151_s22 = scalar_lea.vmem %s2150_s24, 1024  ;;  %p2152_p7 = scmp.lt.s32.totalorder %s330_s13, %s2150_s24 }
  0x1f   : > { %p2148_p6 = pneg %p2147_p5  ;;  %p2153_p10 = scmp.lt.s32.totalorder %s2151_s22, %s2144_s19 }
  0x21   : > { %p2154_p12 = por %p2153_p10, %p2152_p7 }
  0x23   : > { %p2155_p4 = pnand %p2154_p12, %p2148_p6 }
  0x25   : > { %2158 = shalt.err (!%p2155_p4)
}
  0x26   : > { %s2298_s15 = smov 128   ;;  %s2299_s21 = smov 8  }
  0x27   : > { %1995 = dma.hbm_to_vmem [thread:$0]  (!%p2432_p0), %s328_s26, 512, %s330_s13, %s319_s12, %s2298_s15, %s2298_s15, %s2299_s21  }
  0x28   : > { %p337_p13 = scmp.lt.s32.totalorder %s2295_s10, 3 }
  0x2a   : > { %p338_p2 = pnand %p1797_p1, %p337_p13 }
  0x2b   : > { %s2445_s9 = sand.u32 (!%p338_p2), 1, %s2279_s28  }
  0x2c   : > { %341 = sbr.rel (%p338_p2) target bundleno = 5693 (0x163d), region = 44  ;;  %s1798_s19 = sshll.u32 (!%p338_p2), %s2445_s9, 5 }
  0x2d   : > { %s344_s23 = scalar_lea.sflag (!%p338_p2), [#allocation5], %s2445_s9  ;;  %s347_s25 = scalar_lea.vmem (!%p338_p2), [#allocation4], %s1798_s19 }
  0x31   : > { %2262 = dma.done.wait (%p2406_p8), %s344_s23, 512  }
  0x32   : > { %2264 = vsyncadd (%p2406_p8), %s344_s23, 4294966784  ;;  %v2300_v0 = vmov 0.0   ;;  %vm2301_vm0 = vmmov 0   ;;  %vm434_vm1 = vcmask 254976   ;;  %v2459_v1 = vld [vmem:[%s347_s25 + $0x18] sm:$0xff]  ;;  %v2461_v2 = vld [vmem:[%s347_s25 + $0x10] sm:$0xff] }
  0x33   : > { %1896 = vmatprep.subr.mxu0 %v2300_v0  ;;  %1904 = vmatprep.mubr.msk.f32.mxu0 %vm2301_vm0, %v2300_v0  ;;  %v433_v3 = vld [vmem:[%s2857_s3] sm:$0x3]  ;;  %v2469_v4 = vld [vmem:[%s347_s25 + $0x8] sm:$0xff]  ;;  %v2476_v5 = vld [vmem:[%s347_s25] sm:$0xff]  ;;  %vm448_vm2 = vcmask 261120   ;;  %v2302_v8 = vmov 0  }
  0x34   : > { %1907 = vmatprep.subr.mxu1 %v2300_v0  ;;  %1915 = vmatprep.mubr.msk.f32.mxu1 %vm2301_vm0, %v2300_v0  ;;  %435 = vst.msk [vmem:[#allocation2] sm:$0x3] %vm434_vm1, %v433_v3  ;;  %v436_v7 = vld [vmem:[%s2858_s4] sm:$0x3]  ;;  %p409_p8 = scmp.lt.s32.totalorder %s2287_s30, 1  ;;  %s2876_s0 = sld [smem:[#allocation17_spill]] }
  0x35   : > { %1897 = vmatpush3.msra.mxu0 %v2459_v1  ;;  %1908 = vmatpush3.msra.mxu1 %v2459_v1  ;;  %437 = vst.msk [vmem:[#allocation3] sm:$0x3] %vm434_vm1, %v436_v7  ;;  %s2303_s21 = smov 64   ;;  %s2866_s12 = smov 32   ;;  %v440_v23 = vld [vmem:[%s2859_s5] sm:$0x3] }
  0x36   : > { %1898 = vmatprep.subr.mxu0 %v2300_v0  ;;  %1909 = vmatprep.subr.mxu1 %v2300_v0  ;;  %s410_s16 = scalar_select %p409_p8, %s2287_s30, 1  ;;  %v2526_v28 = vld [vmem:[%s2857_s3] sm:$0x3] }
  0x37   : > { %1899 = vmatpush3.msra.mxu0 %v2461_v2  ;;  %1910 = vmatpush3.msra.mxu1 %v2461_v2  ;;  %s2305_s26 = smov 96   ;;  %v2540_v40 = vld [vmem:[%s2858_s4] sm:$0x3]  ;;  %s1562_s23 = sand.u32 1, %s2386_s11  }
  0x38   : > { %1900 = vmatprep.subr.mxu0 %v2300_v0  ;;  %1911 = vmatprep.subr.mxu1 %v2300_v0  ;;  %s1853_s14 = sshll.u32 %s410_s16, 4  ;;  %s2306_s22 = smov [#allocation8]  }
  0x39   : > { %1901 = vmatpush3.msra.mxu0 %v2469_v4  ;;  %1912 = vmatpush3.msra.mxu1 %v2469_v4  ;;  %s2514_s25 = scalar_lea.vmem %s2855_s1, %s1853_s14 }
  0x3a   : > { %1902 = vmatprep.subr.mxu0 %v2300_v0  ;;  %1913 = vmatprep.subr.mxu1 %v2300_v0  ;;  %s2507_s15 = scalar_lea.vmem %s2876_s0, %s1853_s14  ;;  %v551_v15 = vld [vmem:[%s2514_s25] sm:$0x3]  ;;  %v1811_v41 = vld [vmem:[%s2514_s25 + $0x2] sm:$0x3] }
  0x3b   : > { %1903 = vmatpush3.msra.mxu0 %v2476_v5  ;;  %1914 = vmatpush3.msra.mxu1 %v2476_v5  ;;  %v445_v6 = vld [vmem:[#allocation2] sm:$0x3]  ;;  %v558_v22 = vsub.f32 1.0, %v551_v15  ;;  %v698_v43 = vsub.f32 1.0, %v1811_v41  ;;  %v1808_v48 = vld [vmem:[%s2507_s15 + $0x2] sm:$0x3] }
  0x3c   : > { %1918 = vmatprep.subr.mxu0 %v2300_v0  ;;  %1929 = vmatprep.subr.mxu1 %v2300_v0  ;;  %v447_v9 = vld [vmem:[%s2507_s15] sm:$0x3]  ;;  %v446_v14 = vld [vmem:[#allocation3] sm:$0x3] }
  0x3d   : > { %1905 = vmatmul.mubr.msk.f32.vlgmr.msra.gmra.mxu0 %vm448_vm2, %v445_v6  ;;  %2066 = vset.pattern.permute.xlu0 %v2302_v8 }
  0x3e   : > { %1919 = vmatpush3.msra.mxu0 %v2459_v1  ;;  %1926 = vmatprep.mubr.msk.f32.mxu0 %vm2301_vm0, %v2300_v0 }
  0x3f   : > { %1920 = vmatprep.subr.mxu0 %v2300_v0  ;;  %2065 = vset.pattern.permute.xlu1 %v2302_v8 }
  0x40   : > { %1921 = vmatpush3.msra.mxu0 %v2461_v2 }
  0x41   : > { %1922 = vmatprep.subr.mxu0 %v2300_v0 }
  0x42   : > { %1923 = vmatpush3.msra.mxu0 %v2469_v4 }
  0x43   : > { %1924 = vmatprep.subr.mxu0 %v2300_v0 }
  0x44   : > { %1925 = vmatpush3.msra.mxu0 %v2476_v5 }
  0x45   : > { %1940 = vmatprep.subr.mxu0 %v2300_v0 }
  0xfd   : > { %v518_v10 = vpop.f32.mrf.mxu0 }
  0xfe   : > { %v522_v11 = vadd.f32 %v518_v10, %v447_v9 }
  0xff   : > { %v1906_v12 = vpop.f32.mrf.mxu0 }
 0x100   : > { %2067 = vtanh.f32 %v522_v11  ;;  %v1807_v16 = vmul.f32 -1.442695, %v522_v11 }
 0x102   : > { %2069 = vpow2.f32 %v1807_v16 }
 0x10d   : > { %v2068_v13 = vpop.eup %2067 }
 0x10e   : > { %536 = vrot.lane.b32.xlu0 %v2068_v13, %s2303_s21  ;;  %v1816_v13 = vld [vmem:[%s2514_s25 + $0x4] sm:$0x3] }
 0x10f   : > { %v2070_v17 = vpop.eup %2069 }
 0x110   : > { %v526_v18 = vadd.f32 1.0, %v2070_v17 }
 0x112   : > { %531 = vrot.lane.b32.xlu0 %v446_v14, %s2866_s12  ;;  %2071 = vrcp.f32 %v526_v18 }
 0x116   : > { %554 = vperm.xlu0 %2066, %v551_v15   ;;  %v834_v15 = vsub.f32 1.0, %v1816_v13 }
 0x11a   : > { %584 = vrot.lane.b32.xlu0 %v440_v23, %s2305_s26 }
 0x11f   : > { %v2072_v19 = vpop.eup %2071 }
 0x180   : > { %v537_v20 = vpop.permute.xlu0 %536 }
 0x181   : > { %v539_v21 = vmul.f32 %v2072_v19, %v537_v20  ;;  %v1813_v20 = vld [vmem:[%s2507_s15 + $0x4] sm:$0x3] }
 0x183   : > { %541 = vrot.lane.b32.xlu1 %v539_v21, %s2866_s12 }
 0x184   : > { %v532_v24 = vpop.permute.xlu0 %531 }
 0x185   : > { %v534_v25 = vmul.f32 %v2072_v19, %v532_v24 }
 0x187   : > { %561 = vperm.xlu1 %2065, %v558_v22  }
 0x191   : > { %v555_v32 = vpop.permute.xlu0 %554 }
 0x195   : > { %v2531_v37 = vpop.permute.xlu0 %584 }
 0x1f5   : > { %v542_v26 = vpop.permute.xlu1 %541 }
 0x1f6   : > { %v544_v27 = vadd.f32 %v542_v26, %v534_v25 }
 0x1f8   : > { %2073 = vtanh.f32 %v544_v27  ;;  %v570_v45 = vmul.f32 %v555_v32, %v544_v27 }
 0x202   : > { %v562_v29 = vpop.permute.xlu1 %561 }
 0x203   : > { %v564_v31 = vmul.f32 %v562_v29, %v2526_v28  ;;  %v571_v42 = vmul.f32 %v562_v29, %v2540_v40 }
 0x205   : > { %v2074_v30 = vpop.eup %2073 }
 0x206   : > { %547 = vrot.lane.b32.xlu1 %v2074_v30, %s2303_s21 }
 0x20a   : > { %566 = vrot.lane.b32.xlu1 %v564_v31, %s2305_s26 }
 0x278   : > { %v548_v33 = vpop.permute.xlu1 %547 }
 0x279   : > { %v550_v34 = vmul.f32 %v2072_v19, %v548_v33 }
 0x27b   : > { %v557_v35 = vmul.f32 %v555_v32, %v550_v34 }
 0x27c   : > { %v567_v36 = vpop.permute.xlu1 %566 }
 0x27d   : > { %v2533_v38 = vadd.f32 %v567_v36, %v557_v35 }
 0x27f   : > { %v587_v39 = vmul.f32 %v2531_v37, %v2533_v38 }
 0x281   : > { %591 = vrot.lane.b32.xlu1 %v587_v39, %s2866_s12 }
 0x285   : > { %573 = vrot.lane.b32.xlu1 %v571_v42, %s2866_s12 }
 0x289   : > { %701 = vperm.xlu1 %2065, %v698_v43  }
 0x2f3   : > { %v592_v44 = vpop.permute.xlu1 %591 }
 0x2f4   : > { %1916 = vmatmul.mubr.msk.f32.vlgmr.msra.gmra.mxu1 %vm448_vm2, %v592_v44 }
 0x2f5   : > { %1930 = vmatpush3.msra.mxu1 %v2459_v1  ;;  %1937 = vmatprep.mubr.msk.f32.mxu1 %vm2301_vm0, %v2300_v0 }
 0x2f6   : > { %1931 = vmatprep.subr.mxu1 %v2300_v0 }
 0x2f7   : > { %v574_v46 = vpop.permute.xlu1 %573  ;;  %1932 = vmatpush3.msra.mxu1 %v2461_v2 }
 0x2f8   : > { %v576_v47 = vadd.f32 %v574_v46, %v570_v45  ;;  %1933 = vmatprep.subr.mxu1 %v2300_v0 }
 0x2f9   : > { %1934 = vmatpush3.msra.mxu1 %v2469_v4 }
 0x2fa   : > { %1935 = vmatprep.subr.mxu1 %v2300_v0 }
 0x2fb   : > { %1936 = vmatpush3.msra.mxu1 %v2476_v5 }
 0x2fc   : > { %1951 = vmatprep.subr.mxu1 %v2300_v0 }
 0x304   : > { %v702_v59 = vpop.permute.xlu1 %701 }
 0x305   : > { %v704_v60 = vmul.f32 %v702_v59, %v2526_v28  ;;  %v711_v14 = vmul.f32 %v702_v59, %v2540_v40 }
 0x3b4   : > { %v661_v49 = vpop.f32.mrf.mxu1 }
 0x3b5   : > { %v665_v50 = vadd.f32 %v1808_v48, %v661_v49  ;;  %v1821_v48 = vld [vmem:[%s2514_s25 + $0x6] sm:$0x3] }
 0x3b6   : > { %v1917_v51 = vpop.f32.mrf.mxu1 }
 0x3b7   : > { %2075 = vtanh.f32 %v665_v50  ;;  %v1810_v53 = vmul.f32 -1.442695, %v665_v50  ;;  %v970_v50 = vsub.f32 1.0, %v1821_v48 }
 0x3b9   : > { %2077 = vpow2.f32 %v1810_v53 }
 0x3c4   : > { %v2076_v52 = vpop.eup %2075 }
 0x3c5   : > { %675 = vrot.lane.b32.xlu0 %v2076_v52, %s2303_s21 }
 0x3c6   : > { %v2078_v54 = vpop.eup %2077 }
 0x3c7   : > { %v669_v55 = vadd.f32 1.0, %v2078_v54 }
 0x3c9   : > { %2079 = vrcp.f32 %v669_v55  ;;  %v1818_v55 = vld [vmem:[%s2507_s15 + $0x6] sm:$0x3] }
 0x3d6   : > { %v2080_v56 = vpop.eup %2079 }
 0x3d7   : > { %v673_v61 = vmul.f32 %v2080_v56, %v576_v47 }
 0x437   : > { %v676_v57 = vpop.permute.xlu0 %675 }
 0x438   : > { %v678_v58 = vmul.f32 %v2080_v56, %v676_v57 }
 0x43a   : > { %680 = vrot.lane.b32.xlu0 %v678_v58, %s2866_s12 }
 0x43e   : > { %694 = vperm.xlu0 %2066, %v1811_v41  }
 0x442   : > { %706 = vrot.lane.b32.xlu0 %v704_v60, %s2305_s26 }
 0x4ac   : > { %v681_v62 = vpop.permute.xlu0 %680 }
 0x4ad   : > { %v683_v63 = vadd.f32 %v681_v62, %v673_v61 }
 0x4af   : > { %2081 = vtanh.f32 %v683_v63 }
 0x4b9   : > { %v695_v6 = vpop.permute.xlu0 %694 }
 0x4ba   : > { %v710_v17 = vmul.f32 %v695_v6, %v683_v63 }
 0x4bc   : > { %v2082_v3 = vpop.eup %2081 }
 0x4bd   : > { %686 = vrot.lane.b32.xlu1 %v2082_v3, %s2303_s21  ;;  %v707_v10 = vpop.permute.xlu0 %706 }
 0x52f   : > { %v687_v7 = vpop.permute.xlu1 %686 }
 0x530   : > { %v689_v8 = vmul.f32 %v2080_v56, %v687_v7 }
 0x532   : > { %v697_v9 = vmul.f32 %v695_v6, %v689_v8 }
 0x534   : > { %v2563_v11 = vadd.f32 %v707_v10, %v697_v9 }
 0x536   : > { %v723_v12 = vmul.f32 %v2563_v11, %v2531_v37 }
 0x538   : > { %727 = vrot.lane.b32.xlu1 %v723_v12, %s2866_s12 }
 0x53c   : > { %713 = vrot.lane.b32.xlu1 %v711_v14, %s2866_s12 }
 0x540   : > { %837 = vperm.xlu1 %2065, %v834_v15  }
 0x5aa   : > { %v728_v16 = vpop.permute.xlu1 %727 }
 0x5ab   : > { %1927 = vmatmul.mubr.msk.f32.vlgmr.msra.gmra.mxu0 %vm448_vm2, %v728_v16 }
 0x5ac   : > { %1941 = vmatpush3.msra.mxu0 %v2459_v1  ;;  %1948 = vmatprep.mubr.msk.f32.mxu0 %vm2301_vm0, %v2300_v0 }
 0x5ad   : > { %1942 = vmatprep.subr.mxu0 %v2300_v0 }
 0x5ae   : > { %v714_v18 = vpop.permute.xlu1 %713  ;;  %1943 = vmatpush3.msra.mxu0 %v2461_v2 }
 0x5af   : > { %v716_v19 = vadd.f32 %v714_v18, %v710_v17  ;;  %1944 = vmatprep.subr.mxu0 %v2300_v0 }
 0x5b0   : > { %1945 = vmatpush3.msra.mxu0 %v2469_v4 }
 0x5b1   : > { %1946 = vmatprep.subr.mxu0 %v2300_v0 }
 0x5b2   : > { %1947 = vmatpush3.msra.mxu0 %v2476_v5 }
 0x5b3   : > { %1962 = vmatprep.subr.mxu0 %v2300_v0 }
 0x5bb   : > { %v838_v32 = vpop.permute.xlu1 %837 }
 0x5bc   : > { %v840_v33 = vmul.f32 %v838_v32, %v2526_v28  ;;  %v847_v49 = vmul.f32 %v838_v32, %v2540_v40 }
 0x66b   : > { %v797_v21 = vpop.f32.mrf.mxu0 }
 0x66c   : > { %v801_v22 = vadd.f32 %v1813_v20, %v797_v21  ;;  %v1826_v21 = vld [vmem:[%s2514_s25 + $0x8] sm:$0x3] }
 0x66d   : > { %v1928_v23 = vpop.f32.mrf.mxu0 }
 0x66e   : > { %2083 = vtanh.f32 %v801_v22  ;;  %v1815_v25 = vmul.f32 -1.442695, %v801_v22  ;;  %v1106_v23 = vsub.f32 1.0, %v1826_v21 }
 0x670   : > { %2085 = vpow2.f32 %v1815_v25 }
 0x67b   : > { %v2084_v24 = vpop.eup %2083 }
 0x67c   : > { %811 = vrot.lane.b32.xlu0 %v2084_v24, %s2303_s21 }
 0x67d   : > { %v2086_v26 = vpop.eup %2085 }
 0x67e   : > { %v805_v27 = vadd.f32 1.0, %v2086_v26 }
 0x680   : > { %2087 = vrcp.f32 %v805_v27 }
 0x68d   : > { %v2088_v29 = vpop.eup %2087 }
 0x68e   : > { %v809_v34 = vmul.f32 %v2088_v29, %v716_v19 }
 0x6ee   : > { %v812_v30 = vpop.permute.xlu0 %811 }
 0x6ef   : > { %v814_v31 = vmul.f32 %v2088_v29, %v812_v30 }
 0x6f1   : > { %816 = vrot.lane.b32.xlu0 %v814_v31, %s2866_s12 }
 0x6f5   : > { %830 = vperm.xlu0 %2066, %v1816_v13  }
 0x6f9   : > { %842 = vrot.lane.b32.xlu0 %v840_v33, %s2305_s26 }
 0x763   : > { %v817_v35 = vpop.permute.xlu0 %816 }
 0x764   : > { %v819_v36 = vadd.f32 %v817_v35, %v809_v34 }
 0x766   : > { %2089 = vtanh.f32 %v819_v36 }
 0x770   : > { %v831_v41 = vpop.permute.xlu0 %830 }
 0x771   : > { %v846_v52 = vmul.f32 %v831_v41, %v819_v36 }
 0x773   : > { %v2090_v39 = vpop.eup %2089 }
 0x774   : > { %822 = vrot.lane.b32.xlu1 %v2090_v39, %s2303_s21  ;;  %v843_v45 = vpop.permute.xlu0 %842 }
 0x7e6   : > { %v823_v42 = vpop.permute.xlu1 %822 }
 0x7e7   : > { %v825_v43 = vmul.f32 %v2088_v29, %v823_v42  ;;  %v1823_v29 = vld [vmem:[%s2507_s15 + $0x8] sm:$0x3] }
 0x7e9   : > { %v833_v44 = vmul.f32 %v831_v41, %v825_v43 }
 0x7eb   : > { %v2588_v46 = vadd.f32 %v843_v45, %v833_v44 }
 0x7ed   : > { %v859_v47 = vmul.f32 %v2588_v46, %v2531_v37 }
 0x7ef   : > { %863 = vrot.lane.b32.xlu1 %v859_v47, %s2866_s12 }
 0x7f3   : > { %849 = vrot.lane.b32.xlu1 %v847_v49, %s2866_s12 }
 0x7f7   : > { %973 = vperm.xlu1 %2065, %v970_v50  }
 0x861   : > { %v864_v51 = vpop.permute.xlu1 %863 }
 0x862   : > { %1938 = vmatmul.mubr.msk.f32.vlgmr.msra.gmra.mxu1 %vm448_vm2, %v864_v51 }
 0x863   : > { %1952 = vmatpush3.msra.mxu1 %v2459_v1  ;;  %1959 = vmatprep.mubr.msk.f32.mxu1 %vm2301_vm0, %v2300_v0 }
 0x864   : > { %1953 = vmatprep.subr.mxu1 %v2300_v0 }
 0x865   : > { %v850_v53 = vpop.permute.xlu1 %849  ;;  %1954 = vmatpush3.msra.mxu1 %v2461_v2 }
 0x866   : > { %v852_v54 = vadd.f32 %v850_v53, %v846_v52  ;;  %1955 = vmatprep.subr.mxu1 %v2300_v0 }
 0x867   : > { %1956 = vmatpush3.msra.mxu1 %v2469_v4 }
 0x868   : > { %1957 = vmatprep.subr.mxu1 %v2300_v0 }
 0x869   : > { %1958 = vmatpush3.msra.mxu1 %v2476_v5 }
 0x86a   : > { %1973 = vmatprep.subr.mxu1 %v2300_v0 }
 0x872   : > { %v974_v7 = vpop.permute.xlu1 %973 }
 0x873   : > { %v976_v8 = vmul.f32 %v974_v7, %v2526_v28  ;;  %v983_v22 = vmul.f32 %v974_v7, %v2540_v40 }
 0x922   : > { %v933_v56 = vpop.f32.mrf.mxu1 }
 0x923   : > { %v937_v57 = vadd.f32 %v1818_v55, %v933_v56 }
 0x924   : > { %v1939_v58 = vpop.f32.mrf.mxu1 }
 0x925   : > { %2091 = vtanh.f32 %v937_v57  ;;  %v1820_v60 = vmul.f32 -1.442695, %v937_v57  ;;  %v1831_v57 = vld [vmem:[%s2514_s25 + $0xa] sm:$0x3] }
 0x927   : > { %2093 = vpow2.f32 %v1820_v60 }
 0x932   : > { %v2092_v59 = vpop.eup %2091 }
 0x933   : > { %947 = vrot.lane.b32.xlu0 %v2092_v59, %s2303_s21  ;;  %v1242_v59 = vsub.f32 1.0, %v1831_v57 }
 0x934   : > { %v2094_v61 = vpop.eup %2093 }
 0x935   : > { %v941_v62 = vadd.f32 1.0, %v2094_v61 }
 0x937   : > { %2095 = vrcp.f32 %v941_v62 }
 0x944   : > { %v2096_v63 = vpop.eup %2095 }
 0x945   : > { %v945_v9 = vmul.f32 %v2096_v63, %v852_v54 }
 0x9a5   : > { %v948_v3 = vpop.permute.xlu0 %947 }
 0x9a6   : > { %v950_v6 = vmul.f32 %v2096_v63, %v948_v3  ;;  %v1828_v3 = vld [vmem:[%s2507_s15 + $0xa] sm:$0x3] }
 0x9a8   : > { %952 = vrot.lane.b32.xlu0 %v950_v6, %s2866_s12 }
 0x9ac   : > { %966 = vperm.xlu0 %2066, %v1821_v48  }
 0x9b0   : > { %978 = vrot.lane.b32.xlu0 %v976_v8, %s2305_s26 }
 0xa1a   : > { %v953_v10 = vpop.permute.xlu0 %952 }
 0xa1b   : > { %v955_v12 = vadd.f32 %v953_v10, %v945_v9 }
 0xa1d   : > { %2097 = vtanh.f32 %v955_v12 }
 0xa27   : > { %v967_v14 = vpop.permute.xlu0 %966 }
 0xa28   : > { %v982_v25 = vmul.f32 %v967_v14, %v955_v12 }
 0xa2a   : > { %v2098_v13 = vpop.eup %2097 }
 0xa2b   : > { %958 = vrot.lane.b32.xlu1 %v2098_v13, %s2303_s21  ;;  %v979_v18 = vpop.permute.xlu0 %978 }
 0xa9d   : > { %v959_v15 = vpop.permute.xlu1 %958 }
 0xa9e   : > { %v961_v16 = vmul.f32 %v2096_v63, %v959_v15 }
 0xaa0   : > { %v969_v17 = vmul.f32 %v967_v14, %v961_v16 }
 0xaa2   : > { %v2613_v19 = vadd.f32 %v979_v18, %v969_v17 }
 0xaa4   : > { %v995_v20 = vmul.f32 %v2613_v19, %v2531_v37 }
 0xaa6   : > { %999 = vrot.lane.b32.xlu1 %v995_v20, %s2866_s12 }
 0xaaa   : > { %985 = vrot.lane.b32.xlu1 %v983_v22, %s2866_s12 }
 0xaae   : > { %1109 = vperm.xlu1 %2065, %v1106_v23  }
 0xb18   : > { %v1000_v24 = vpop.permute.xlu1 %999 }
 0xb19   : > { %1949 = vmatmul.mubr.msk.f32.vlgmr.msra.gmra.mxu0 %vm448_vm2, %v1000_v24 }
 0xb1a   : > { %1963 = vmatpush3.msra.mxu0 %v2459_v1  ;;  %1970 = vmatprep.mubr.msk.f32.mxu0 %vm2301_vm0, %v2300_v0 }
 0xb1b   : > { %1964 = vmatprep.subr.mxu0 %v2300_v0 }
 0xb1c   : > { %v986_v26 = vpop.permute.xlu1 %985  ;;  %1965 = vmatpush3.msra.mxu0 %v2461_v2 }
 0xb1d   : > { %v988_v27 = vadd.f32 %v986_v26, %v982_v25  ;;  %1966 = vmatprep.subr.mxu0 %v2300_v0  ;;  %v1836_v26 = vld [vmem:[%s2514_s25 + $0xc] sm:$0x3] }
 0xb1e   : > { %1967 = vmatpush3.msra.mxu0 %v2469_v4 }
 0xb1f   : > { %1968 = vmatprep.subr.mxu0 %v2300_v0 }
 0xb20   : > { %1969 = vmatpush3.msra.mxu0 %v2476_v5 }
 0xb29   : > { %v1110_v43 = vpop.permute.xlu1 %1109 }
 0xb2a   : > { %v1112_v44 = vmul.f32 %v1110_v43, %v2526_v28  ;;  %v1119_v58 = vmul.f32 %v1110_v43, %v2540_v40 }
 0xbd9   : > { %v1069_v30 = vpop.f32.mrf.mxu0 }
 0xbda   : > { %v1073_v31 = vadd.f32 %v1823_v29, %v1069_v30  ;;  %v1378_v29 = vsub.f32 1.0, %v1836_v26 }
 0xbdb   : > { %v1950_v32 = vpop.f32.mrf.mxu0 }
 0xbdc   : > { %2099 = vtanh.f32 %v1073_v31  ;;  %v1825_v34 = vmul.f32 -1.442695, %v1073_v31 }
 0xbde   : > { %2101 = vpow2.f32 %v1825_v34  ;;  %v1833_v34 = vld [vmem:[%s2507_s15 + $0xc] sm:$0x3] }
 0xbe9   : > { %v2100_v33 = vpop.eup %2099 }
 0xbea   : > { %1083 = vrot.lane.b32.xlu0 %v2100_v33, %s2303_s21 }
 0xbeb   : > { %v2102_v35 = vpop.eup %2101 }
 0xbec   : > { %v1077_v36 = vadd.f32 1.0, %v2102_v35 }
 0xbee   : > { %2103 = vrcp.f32 %v1077_v36 }
 0xbfb   : > { %v2104_v39 = vpop.eup %2103 }
 0xbfc   : > { %v1081_v45 = vmul.f32 %v2104_v39, %v988_v27 }
 0xc5c   : > { %v1084_v41 = vpop.permute.xlu0 %1083 }
 0xc5d   : > { %v1086_v42 = vmul.f32 %v2104_v39, %v1084_v41 }
 0xc5f   : > { %1088 = vrot.lane.b32.xlu0 %v1086_v42, %s2866_s12 }
 0xc63   : > { %1102 = vperm.xlu0 %2066, %v1826_v21  }
 0xc67   : > { %1114 = vrot.lane.b32.xlu0 %v1112_v44, %s2305_s26 }
 0xcd1   : > { %v1089_v47 = vpop.permute.xlu0 %1088 }
 0xcd2   : > { %v1091_v48 = vadd.f32 %v1089_v47, %v1081_v45 }
 0xcd4   : > { %2105 = vtanh.f32 %v1091_v48 }
 0xcde   : > { %v1103_v50 = vpop.permute.xlu0 %1102 }
 0xcdf   : > { %v1118_v61 = vmul.f32 %v1103_v50, %v1091_v48 }
 0xce1   : > { %v2106_v49 = vpop.eup %2105 }
 0xce2   : > { %1094 = vrot.lane.b32.xlu1 %v2106_v49, %s2303_s21  ;;  %v1115_v54 = vpop.permute.xlu0 %1114 }
 0xd54   : > { %v1095_v51 = vpop.permute.xlu1 %1094 }
 0xd55   : > { %v1097_v52 = vmul.f32 %v2104_v39, %v1095_v51 }
 0xd57   : > { %v1105_v53 = vmul.f32 %v1103_v50, %v1097_v52 }
 0xd59   : > { %v2637_v55 = vadd.f32 %v1115_v54, %v1105_v53 }
 0xd5b   : > { %v1131_v56 = vmul.f32 %v2637_v55, %v2531_v37 }
 0xd5d   : > { %1135 = vrot.lane.b32.xlu1 %v1131_v56, %s2866_s12 }
 0xd61   : > { %1121 = vrot.lane.b32.xlu1 %v1119_v58, %s2866_s12 }
 0xd65   : > { %1245 = vperm.xlu1 %2065, %v1242_v59  }
 0xdcf   : > { %v1136_v60 = vpop.permute.xlu1 %1135 }
 0xdd0   : > { %1960 = vmatmul.mubr.msk.f32.vlgmr.msra.gmra.mxu1 %vm448_vm2, %v1136_v60 }
 0xdd1   : > { %1974 = vmatpush3.msra.mxu1 %v2459_v1  ;;  %1981 = vmatprep.mubr.msk.f32.mxu1 %vm2301_vm0, %v2300_v0 }
 0xdd2   : > { %1975 = vmatprep.subr.mxu1 %v2300_v0 }
 0xdd3   : > { %v1122_v62 = vpop.permute.xlu1 %1121  ;;  %1976 = vmatpush3.msra.mxu1 %v2461_v2 }
 0xdd4   : > { %v1124_v63 = vadd.f32 %v1122_v62, %v1118_v61  ;;  %1977 = vmatprep.subr.mxu1 %v2300_v0 }
 0xdd5   : > { %1978 = vmatpush3.msra.mxu1 %v2469_v4 }
 0xdd6   : > { %1979 = vmatprep.subr.mxu1 %v2300_v0 }
 0xdd7   : > { %1980 = vmatpush3.msra.mxu1 %v2476_v5 }
 0xde0   : > { %v1246_v0 = vpop.permute.xlu1 %1245 }
 0xde1   : > { %v1248_v5 = vmul.f32 %v1246_v0, %v2526_v28  ;;  %v1255_v27 = vmul.f32 %v1246_v0, %v2540_v40 }
 0xe90   : > { %v1205_v1 = vpop.f32.mrf.mxu1 }
 0xe91   : > { %v1209_v6 = vadd.f32 %v1828_v3, %v1205_v1 }
 0xe92   : > { %v1961_v7 = vpop.f32.mrf.mxu1 }
 0xe93   : > { %2107 = vtanh.f32 %v1209_v6  ;;  %v1830_v9 = vmul.f32 -1.442695, %v1209_v6 }
 0xe95   : > { %2109 = vpow2.f32 %v1830_v9 }
 0xea0   : > { %v2108_v8 = vpop.eup %2107 }
 0xea1   : > { %1219 = vrot.lane.b32.xlu0 %v2108_v8, %s2303_s21 }
 0xea2   : > { %v2110_v2 = vpop.eup %2109 }
 0xea3   : > { %v1213_v10 = vadd.f32 1.0, %v2110_v2  ;;  %v1838_v2 = vld [vmem:[%s2507_s15 + $0xe] sm:$0x3]  ;;  %s1799_s15 = sshll.u32 %s2445_s9, 4 }
 0xea4   : > { %s2693_s19 = scalar_lea.vmem [#allocation7], %s1799_s15 }
 0xea5   : > { %2111 = vrcp.f32 %v1213_v10 }
 0xeb2   : > { %v2112_v12 = vpop.eup %2111 }
 0xeb3   : > { %v1217_v14 = vmul.f32 %v2112_v12, %v1124_v63  ;;  %v1841_v63 = vld [vmem:[%s2514_s25 + $0xe] sm:$0x3]  ;;  %s1848_s25 = sshll.u32 %s2287_s30, 5 }
 0xeb4   : > { %v1514_v1 = vsub.f32 1.0, %v1841_v63  ;;  %s2726_s11 = scalar_lea.hbm %s2861_s7, %s1848_s25 }
 0xf13   : > { %v1220_v13 = vpop.permute.xlu0 %1219 }
 0xf14   : > { %v1222_v4 = vmul.f32 %v2112_v12, %v1220_v13 }
 0xf16   : > { %1224 = vrot.lane.b32.xlu0 %v1222_v4, %s2866_s12 }
 0xf1a   : > { %1238 = vperm.xlu0 %2066, %v1831_v57  }
 0xf1e   : > { %1250 = vrot.lane.b32.xlu0 %v1248_v5, %s2305_s26 }
 0xf88   : > { %v1225_v15 = vpop.permute.xlu0 %1224 }
 0xf89   : > { %v1227_v16 = vadd.f32 %v1225_v15, %v1217_v14 }
 0xf8b   : > { %2113 = vtanh.f32 %v1227_v16 }
 0xf95   : > { %v1239_v18 = vpop.permute.xlu0 %1238 }
 0xf96   : > { %v1254_v31 = vmul.f32 %v1239_v18, %v1227_v16 }
 0xf98   : > { %v2114_v17 = vpop.eup %2113 }
 0xf99   : > { %1230 = vrot.lane.b32.xlu1 %v2114_v17, %s2303_s21  ;;  %v1251_v23 = vpop.permute.xlu0 %1250 }
0x100b   : > { %v1231_v20 = vpop.permute.xlu1 %1230 }
0x100c   : > { %v1233_v21 = vmul.f32 %v2112_v12, %v1231_v20 }
0x100e   : > { %v1241_v22 = vmul.f32 %v1239_v18, %v1233_v21 }
0x1010   : > { %v2661_v24 = vadd.f32 %v1251_v23, %v1241_v22 }
0x1012   : > { %v1267_v25 = vmul.f32 %v2661_v24, %v2531_v37 }
0x1014   : > { %1271 = vrot.lane.b32.xlu1 %v1267_v25, %s2866_s12 }
0x1018   : > { %1257 = vrot.lane.b32.xlu1 %v1255_v27, %s2866_s12 }
0x101c   : > { %1381 = vperm.xlu1 %2065, %v1378_v29  }
0x1086   : > { %v1272_v30 = vpop.permute.xlu1 %1271 }
0x1087   : > { %1971 = vmatmul.mubr.msk.f32.vlgmr.msra.gmra.mxu0 %vm448_vm2, %v1272_v30 }
0x108a   : > { %v1258_v32 = vpop.permute.xlu1 %1257 }
0x108b   : > { %v1260_v33 = vadd.f32 %v1258_v32, %v1254_v31 }
0x1097   : > { %v1382_v49 = vpop.permute.xlu1 %1381 }
0x1098   : > { %v1384_v50 = vmul.f32 %v1382_v49, %v2526_v28  ;;  %v1391_v3 = vmul.f32 %v1382_v49, %v2540_v40 }
0x1147   : > { %v1341_v35 = vpop.f32.mrf.mxu0 }
0x1148   : > { %v1345_v36 = vadd.f32 %v1833_v34, %v1341_v35 }
0x1149   : > { %v1972_v39 = vpop.f32.mrf.mxu0 }
0x114a   : > { %2115 = vtanh.f32 %v1345_v36  ;;  %v1835_v42 = vmul.f32 -1.442695, %v1345_v36 }
0x114c   : > { %2117 = vpow2.f32 %v1835_v42 }
0x1157   : > { %v2116_v41 = vpop.eup %2115 }
0x1158   : > { %1355 = vrot.lane.b32.xlu0 %v2116_v41, %s2303_s21 }
0x1159   : > { %v2118_v43 = vpop.eup %2117 }
0x115a   : > { %v1349_v44 = vadd.f32 1.0, %v2118_v43 }
0x115c   : > { %2119 = vrcp.f32 %v1349_v44 }
0x1169   : > { %v2120_v45 = vpop.eup %2119 }
0x116a   : > { %v1353_v51 = vmul.f32 %v2120_v45, %v1260_v33 }
0x11ca   : > { %v1356_v47 = vpop.permute.xlu0 %1355 }
0x11cb   : > { %v1358_v48 = vmul.f32 %v2120_v45, %v1356_v47 }
0x11cd   : > { %1360 = vrot.lane.b32.xlu0 %v1358_v48, %s2866_s12 }
0x11d1   : > { %1374 = vperm.xlu0 %2066, %v1836_v26  }
0x11d5   : > { %1386 = vrot.lane.b32.xlu0 %v1384_v50, %s2305_s26 }
0x123f   : > { %v1361_v52 = vpop.permute.xlu0 %1360 }
0x1240   : > { %v1363_v53 = vadd.f32 %v1361_v52, %v1353_v51 }
0x1242   : > { %2121 = vtanh.f32 %v1363_v53 }
0x124c   : > { %v1375_v56 = vpop.permute.xlu0 %1374 }
0x124d   : > { %v1390_v7 = vmul.f32 %v1375_v56, %v1363_v53 }
0x124f   : > { %v2122_v54 = vpop.eup %2121 }
0x1250   : > { %1366 = vrot.lane.b32.xlu1 %v2122_v54, %s2303_s21  ;;  %v1387_v60 = vpop.permute.xlu0 %1386 }
0x12c2   : > { %v1367_v57 = vpop.permute.xlu1 %1366 }
0x12c3   : > { %v1369_v58 = vmul.f32 %v2120_v45, %v1367_v57 }
0x12c5   : > { %v1377_v59 = vmul.f32 %v1375_v56, %v1369_v58 }
0x12c7   : > { %v1389_v61 = vadd.f32 %v1387_v60, %v1377_v59 }
0x12c9   : > { %v1403_v62 = vmul.f32 %v1389_v61, %v2531_v37 }
0x12cb   : > { %1407 = vrot.lane.b32.xlu1 %v1403_v62, %s2866_s12 }
0x12cf   : > { %1393 = vrot.lane.b32.xlu1 %v1391_v3, %s2866_s12 }
0x12d3   : > { %1517 = vperm.xlu1 %2065, %v1514_v1  }
0x133d   : > { %v1408_v6 = vpop.permute.xlu1 %1407 }
0x133e   : > { %1982 = vmatmul.mubr.msk.f32.vlgmr.msra.gmra.mxu1 %vm448_vm2, %v1408_v6 }
0x1341   : > { %v1394_v8 = vpop.permute.xlu1 %1393 }
0x1342   : > { %v1396_v9 = vadd.f32 %v1394_v8, %v1390_v7 }
0x134e   : > { %v1518_v18 = vpop.permute.xlu1 %1517 }
0x134f   : > { %v1520_v20 = vmul.f32 %v1518_v18, %v2526_v28  ;;  %v1527_v29 = vmul.f32 %v1518_v18, %v2540_v40 }
0x13fe   : > { %v1477_v10 = vpop.f32.mrf.mxu1 }
0x13ff   : > { %v1481_v12 = vadd.f32 %v1838_v2, %v1477_v10 }
0x1400   : > { %v1983_v13 = vpop.f32.mrf.mxu1 }
0x1401   : > { %2123 = vtanh.f32 %v1481_v12  ;;  %v1840_v0 = vmul.f32 -1.442695, %v1481_v12 }
0x1403   : > { %2125 = vpow2.f32 %v1840_v0 }
0x140e   : > { %v2124_v4 = vpop.eup %2123 }
0x140f   : > { %1491 = vrot.lane.b32.xlu0 %v2124_v4, %s2303_s21 }
0x1410   : > { %v2126_v5 = vpop.eup %2125 }
0x1411   : > { %v1485_v14 = vadd.f32 1.0, %v2126_v5 }
0x1413   : > { %2127 = vrcp.f32 %v1485_v14 }
0x1420   : > { %v2128_v15 = vpop.eup %2127 }
0x1421   : > { %v1489_v21 = vmul.f32 %v2128_v15, %v1396_v9 }
0x1481   : > { %v1492_v16 = vpop.permute.xlu0 %1491 }
0x1482   : > { %v1494_v17 = vmul.f32 %v2128_v15, %v1492_v16 }
0x1484   : > { %1496 = vrot.lane.b32.xlu0 %v1494_v17, %s2866_s12 }
0x1488   : > { %1510 = vperm.xlu0 %2066, %v1841_v63  }
0x148c   : > { %1522 = vrot.lane.b32.xlu0 %v1520_v20, %s2305_s26 }
0x1490   : > { %578 = vrot.lane.b32.xlu0 %v2533_v38, %s2866_s12 }
0x14f6   : > { %v1497_v22 = vpop.permute.xlu0 %1496 }
0x14f7   : > { %v1499_v23 = vadd.f32 %v1497_v22, %v1489_v21 }
0x14f9   : > { %2129 = vtanh.f32 %v1499_v23 }
0x1503   : > { %v1511_v25 = vpop.permute.xlu0 %1510 }
0x1504   : > { %v1526_v31 = vmul.f32 %v1511_v25, %v1499_v23 }
0x1506   : > { %v2130_v26 = vpop.eup %2129 }
0x1507   : > { %1502 = vrot.lane.b32.xlu1 %v2130_v26, %s2303_s21  ;;  %v1523_v27 = vpop.permute.xlu0 %1522  ;;  %s1800_s21 = sshll.u32 %s2445_s9, 1 }
0x1508   : > { %s400_s13 = scalar_lea.vmem [#allocation8], %s1800_s21 }
0x1509   : > { %s1599_s17 = sshll.u32 %s400_s13, 4  ;;  %s2728_s17 = int_to_ptr.vmem [resolvable:$true] %s1599_s17 }
0x150b   : > { %1529 = vrot.lane.b32.xlu1 %v1527_v29, %s2866_s12  ;;  %v579_v28 = vpop.permute.xlu0 %578 }
0x150c   : > { %582 = vst.msk [vmem:[%s2693_s19] sm:$0x3] %vm434_vm1, %v579_v28 }
0x1579   : > { %v1503_v38 = vpop.permute.xlu1 %1502 }
0x157a   : > { %v1505_v30 = vmul.f32 %v2128_v15, %v1503_v38 }
0x157c   : > { %v1513_v32 = vmul.f32 %v1511_v25, %v1505_v30 }
0x157d   : > { %v1530_v33 = vpop.permute.xlu1 %1529 }
0x157e   : > { %v1525_v34 = vadd.f32 %v1523_v27, %v1513_v32  ;;  %v1532_v35 = vadd.f32 %v1530_v33, %v1526_v31 }
0x1580   : > { %1546 = vrot.lane.b32.xlu1 %v1532_v35, %s2305_s26  ;;  %v1539_v40 = vmul.f32 %v1525_v34, %v2531_v37  ;;  %s407_s26 = scalar_lea.vmem [#allocation10], %s1800_s21  ;;  %s2734_s21 = scalar_lea.hbm %s2862_s8, %s1848_s25 }
0x1581   : > { %s1612_s16 = sshll.u32 %s407_s26, 4  ;;  %s2163_s25 = sshll.u32 %s2306_s22, 4  ;;  %s2736_s16 = int_to_ptr.vmem [resolvable:$true] %s1612_s16  ;;  %s2164_s25 = int_to_ptr.vmem [resolvable:$false] %s2163_s25 }
0x1582   : > { %1541 = vrot.lane.b32.xlu0 %v1539_v40, %s2866_s12  ;;  %s2165_s15 = scalar_lea.vmem %s2164_s25, 64  ;;  %p2166_p3 = scmp.lt.s32.totalorder %s2728_s17, %s2164_s25 }
0x1584   : > { %718 = vrot.lane.b32.xlu1 %v2563_v11, %s2866_s12 }
0x1586   : > { %854 = vrot.lane.b32.xlu0 %v2588_v46, %s2866_s12 }
0x1588   : > { %990 = vrot.lane.b32.xlu1 %v2613_v19, %s2866_s12 }
0x158a   : > { %1126 = vrot.lane.b32.xlu0 %v2637_v55, %s2866_s12 }
0x158c   : > { %1262 = vrot.lane.b32.xlu1 %v2661_v24, %s2866_s12 }
0x158e   : > { %1398 = vrot.lane.b32.xlu0 %v1389_v61, %s2866_s12 }
0x1590   : > { %1534 = vrot.lane.b32.xlu1 %v1525_v34, %s2866_s12  ;;  %s2743_s12 = scalar_lea.sflag [#allocation9], %s1562_s23 }
0x15f2   : > { %v1547_v37 = vpop.permute.xlu1 %1546 }
0x15f3   : > { %1549 = vst.msk [vmem:[#allocation3] sm:$0x3] %vm434_vm1, %v1547_v37 }
0x15f4   : > { %v1542_v11 = vpop.permute.xlu0 %1541 }
0x15f5   : > { %1544 = vst.msk [vmem:[#allocation2] sm:$0x3] %vm434_vm1, %v1542_v11 }
0x15f6   : > { %v719_v46 = vpop.permute.xlu1 %718 }
0x15f7   : > { %1812 = vst.msk [vmem:[%s2693_s19 + $0x2] sm:$0x3] %vm434_vm1, %v719_v46 }
0x15f8   : > { %v855_v19 = vpop.permute.xlu0 %854 }
0x15f9   : > { %1817 = vst.msk [vmem:[%s2693_s19 + $0x4] sm:$0x3] %vm434_vm1, %v855_v19 }
0x15fa   : > { %v991_v55 = vpop.permute.xlu1 %990  ;;  %v1555_v24 = vld [vmem:[#allocation3] sm:$0x3] }
0x15fb   : > { %1822 = vst.msk [vmem:[%s2693_s19 + $0x6] sm:$0x3] %vm434_vm1, %v991_v55  ;;  %1556 = vst.msk [vmem:[%s407_s26] sm:$0x3] %vm434_vm1, %v1555_v24  ;;  %s2159_s26 = scalar_lea.vmem %s2728_s17, 32 }
0x15fc   : > { %v1127_v36 = vpop.permute.xlu0 %1126  ;;  %v1553_v39 = vld [vmem:[#allocation2] sm:$0x3]  ;;  %p2160_p12 = scmp.ne.s32.totalorder %s2728_s17, %s2159_s26  ;;  %p2167_p5 = scmp.lt.s32.totalorder %s2165_s15, %s2159_s26 }
0x15fd   : > { %1827 = vst.msk [vmem:[%s2693_s19 + $0x8] sm:$0x3] %vm434_vm1, %v1127_v36  ;;  %1554 = vst.msk [vmem:[%s400_s13] sm:$0x3] %vm434_vm1, %v1553_v39 }
0x15fe   : > { %v1263_v41 = vpop.permute.xlu1 %1262  ;;  %p2161_p0 = pnand %p2160_p12, %p2410_p9  ;;  %p2168_p6 = por %p2167_p5, %p2166_p3 }
0x1600   : > { %p2162_p1 = pneg %p2161_p0 }
0x1602   : > { %p2169_p7 = pnand %p2168_p6, %p2162_p1 }
0x1604   : > { %2172 = shalt.err (!%p2169_p7)
}
0x1605   : > { %s2173_s23 = scalar_lea.hbm %s2726_s11, 32  ;;  %s2177_s22 = scalar_lea.hbm %s2861_s7, 64 }
0x1606   : > { %p2174_p10 = scmp.ne.s32.totalorder %s2726_s11, %s2173_s23  ;;  %p2178_p2 = scmp.lt.s32.totalorder %s2726_s11, %s2861_s7 }
0x1607   : > { %p2179_p8 = scmp.lt.s32.totalorder %s2177_s22, %s2173_s23 }
0x1608   : > { %p2175_p4 = pnand %p2174_p10, %p2410_p9 }
0x1609   : > { %p2180_p12 = por %p2179_p8, %p2178_p2 }
0x160a   : > { %p2176_p13 = pneg %p2175_p4 }
0x160c   : > { %p2181_p0 = pnand %p2180_p12, %p2176_p13 }
0x160e   : > { %2184 = shalt.err (!%p2181_p0)
}
0x160f   : > { %1987 = dma.vmem_to_hbm [thread:$0]  (%p2410_p9), %s2728_s17, 32, %s2726_s11, %s2743_s12   ;;  %1832 = vst.msk [vmem:[%s2693_s19 + $0xa] sm:$0x3] %vm434_vm1, %v1263_v41 }
0x1610   : > { %s2185_s24 = scalar_lea.vmem %s2736_s16, 32  ;;  %s2307_s0 = smov [#allocation10]  }
0x1611   : > { %p2186_p1 = scmp.ne.s32.totalorder %s2736_s16, %s2185_s24  ;;  %s2189_s14 = sshll.u32 %s2307_s0, 4  ;;  %s2190_s14 = int_to_ptr.vmem [resolvable:$false] %s2189_s14 }
0x1612   : > { %s2191_s26 = scalar_lea.vmem %s2190_s14, 64  ;;  %p2192_p6 = scmp.lt.s32.totalorder %s2736_s16, %s2190_s14 }
0x1613   : > { %p2187_p3 = pnand %p2186_p1, %p2410_p9  ;;  %p2193_p7 = scmp.lt.s32.totalorder %s2191_s26, %s2185_s24 }
0x1615   : > { %p2188_p5 = pneg %p2187_p3  ;;  %p2194_p10 = por %p2193_p7, %p2192_p6 }
0x1617   : > { %p2195_p4 = pnand %p2194_p10, %p2188_p5 }
0x1619   : > { %2198 = shalt.err (!%p2195_p4)
}
0x161a   : > { %s2199_s17 = scalar_lea.hbm %s2734_s21, 32  ;;  %s2203_s15 = scalar_lea.hbm %s2862_s8, 64 }
0x161b   : > { %p2200_p13 = scmp.ne.s32.totalorder %s2734_s21, %s2199_s17  ;;  %p2204_p12 = scmp.lt.s32.totalorder %s2734_s21, %s2862_s8 }
0x161c   : > { %p2205_p0 = scmp.lt.s32.totalorder %s2203_s15, %s2199_s17 }
0x161d   : > { %p2201_p2 = pnand %p2200_p13, %p2410_p9 }
0x161e   : > { %p2206_p1 = por %p2205_p0, %p2204_p12 }
0x161f   : > { %p2202_p8 = pneg %p2201_p2 }
0x1621   : > { %p2207_p3 = pnand %p2206_p1, %p2202_p8 }
0x1623   : > { %2210 = shalt.err (!%p2207_p3)
}
0x1624   : > { %1988 = dma.vmem_to_hbm [thread:$0]  (%p2410_p9), %s2736_s16, 32, %s2734_s21, %s2743_s12   ;;  %v1399_v42 = vpop.permute.xlu0 %1398  ;;  %v1535_v43 = vpop.permute.xlu1 %1534 }
0x1625   : > { %s2877_s22 = sshll.u32 %s2693_s19, 4  ;;  %1837 = vst.msk [vmem:[%s2693_s19 + $0xc] sm:$0x3] %vm434_vm1, %v1399_v42  ;;  %s2878_s24 = sshll.u32 %s2287_s30, 8  ;;  %1842 = vst.msk [vmem:[%s2693_s19 + $0xe] sm:$0x3] %vm434_vm1, %v1535_v43  ;;  %s2791_s22 = int_to_ptr.vmem [resolvable:$true] %s2877_s22 }
0x1626   : > { %s2800_s26 = scalar_lea.hbm %s2860_s6, %s2878_s24  ;;  %s1558_s17 = scalar_lea.sflag [#allocation6], %s2445_s9 }
0x1627   : > { %s2211_s12 = scalar_lea.vmem %s2791_s22, 256  ;;  %s2308_s16 = smov [#allocation7]  }
0x1628   : > { %p2212_p5 = scmp.ne.s32.totalorder %s2791_s22, %s2211_s12  ;;  %s2215_s21 = sshll.u32 %s2308_s16, 4  ;;  %s2216_s21 = int_to_ptr.vmem [resolvable:$false] %s2215_s21 }
0x1629   : > { %s2217_s11 = scalar_lea.vmem %s2216_s21, 512  ;;  %p2218_p10 = scmp.lt.s32.totalorder %s2791_s22, %s2216_s21 }
0x162a   : > { %p2213_p6 = pnand %p2212_p5, %p2410_p9  ;;  %p2219_p4 = scmp.lt.s32.totalorder %s2217_s11, %s2211_s12 }
0x162c   : > { %p2214_p7 = pneg %p2213_p6  ;;  %p2220_p13 = por %p2219_p4, %p2218_p10 }
0x162e   : > { %p2221_p2 = pnand %p2220_p13, %p2214_p7 }
0x1630   : > { %2224 = shalt.err (!%p2221_p2)
}
0x1631   : > { %s2225_s30 = scalar_lea.hbm %s2800_s26, 256  ;;  %s2229_s15 = scalar_lea.hbm %s2860_s6, 512 }
0x1632   : > { %p2226_p8 = scmp.ne.s32.totalorder %s2800_s26, %s2225_s30  ;;  %p2230_p1 = scmp.lt.s32.totalorder %s2800_s26, %s2860_s6 }
0x1633   : > { %p2231_p3 = scmp.lt.s32.totalorder %s2229_s15, %s2225_s30 }
0x1634   : > { %p2227_p12 = pnand %p2226_p8, %p2410_p9 }
0x1635   : > { %p2232_p5 = por %p2231_p3, %p2230_p1 }
0x1636   : > { %p2228_p0 = pneg %p2227_p12 }
0x1638   : > { %p2233_p6 = pnand %p2232_p5, %p2228_p0 }
0x163a   : > { %2236 = shalt.err (!%p2233_p6)
}
0x163b   : > { %s2309_s24 = smov 2   ;;  %s2879_s0 = smov 32  }
0x163c   : > { %1986 = dma.vmem_to_hbm [thread:$0]  (%p2410_p9), %s2791_s22, 256, %s2800_s26, %s1558_s17, %s2879_s0, %s2879_s0, %s2309_s24  }
0x163d PF: > { %s1624_s14 = sand.u32 1, %s2275_s27   ;;  %p2880_p7 = scmp.ge.s32.totalorder %s2295_s10, 2 }
0x163e   : > { %s1625_s12 = scalar_lea.sflag [#allocation6], %s1624_s14 }
0x163f   : > { %p1997_p10 = pnand %p2880_p7, %p2419_p11 }
0x1641   : > { %p1998_p4 = pneg %p1997_p10 }
0x1643   : > { %2266 = dma.done.wait (%p1998_p4), %s1625_s12, 256  }
0x1644   : > { %2268 = vsyncadd (%p1998_p4), %s1625_s12, 4294967040  ;;  %s2881_s18 = sadd.s32 4294967294, %s2295_s10  }
0x1645   : > { %s1633_s16 = sand.u32 1, %s2881_s18  }
0x1646   : > { %s1634_s21 = scalar_lea.sflag [#allocation9], %s1633_s16 }
0x1647   : > { %2270 = dma.done.wait (%p1998_p4), %s1634_s21, 64  }
0x1648   : > { %2272 = vsyncadd (%p1998_p4), %s1634_s21, 4294967232  ;;  %s28_s10 = sadd.s32 1, %s2295_s10   ;;  %s2882_s9 = sld [smem:[#allocation16_spill]] }
0x1649   : > { %p25_p9 = scmp.ge.s32.totalorder %s28_s10, 4   ;;  %s2883_s30 = sld [smem:[#allocation14_spill]] }
0x164a   : > { %s2884_s20 = sld [smem:[#allocation15_spill]]  ;;  %s2885_s27 = smov %s2279_s28 }
0x164b   : > { %s2886_s28 = smov %s2283_s29 }
0x164c   :  { %27 = sbr.rel (!%p25_p9) target bundleno = 10 (0xa), region = 156 }
0x164e   : > { %s2887_s29 = smov %s2882_s9 }
0x1650   : > { %s2888_s9 = smov %s2884_s20 }
0x1651   :  { %1648 = vsyncpa [#allocation5], 1 }
0x1652   :  { %1650 = vsyncpa [#allocation5 + $0x1], 1 }
0x1653   :  { %1651 = vsyncpa [#allocation6], 1 }
0x1654   :  { %1653 = vsyncpa [#allocation6 + $0x1], 1 }
0x1655   :  { %1654 = vsyncpa [#allocation9], 1 }
0x1656   :  { %1656 = vsyncpa [#allocation9 + $0x1], 1 }

</bundles_post_ra>
